<compile_context>
chip_gen: v7x
topology: tpu7x:2x2x1
jax: 0.10.0
libtpu: 0.0.40
codegen_flags: <defaults>
</compile_context>

<pallas_src>
import functools
import math

import jax
import jax.numpy as jnp
from jax.experimental import pallas as pl
from jax.experimental.pallas import tpu as pltpu


# ---------------------------------------------------------------------------
# Helpers
# ---------------------------------------------------------------------------

def _round_up(x, m):
    return ((x + m - 1) // m) * m


def _choose_tm(batch):
    """M tile: up to 256 (fills v6e/v7x MXU); >=2 grid steps once batch>=16
    so dimension_semantics=('parallel',) can shard across v7x's 2 TCs."""
    tm = min(_round_up(batch, 8), 256)
    if batch >= 16:
        tm = min(tm, _round_up((batch + 1) // 2, 8))
    return tm


# ---------------------------------------------------------------------------
# Fused VAE forward body (all matmuls + epilogues in VMEM).
#   inputs : x [, eps], w1, b1, w2(=fc21|fc22), b2, w3, b3, w4, b4
#   outputs: recon, mu, logvar
# Weights are (K, N) lane-padded; biases are (1, N) f32.
# ---------------------------------------------------------------------------

def _vae_body(x_ref, eps_ref,
              w1_ref, b1_ref, w2_ref, b2_ref, w3_ref, b3_ref, w4_ref, b4_ref,
              out_ref, mu_ref, logvar_ref):
    f32 = jnp.float32
    cdt = w1_ref.dtype                 # matmul-input compute dtype (bf16 or f32)
    Lp = mu_ref.shape[-1]              # padded latent width (multiple of 128)

    # encode: h1 = relu(fc1(x))        (bias + ReLU fused as f32 epilogue)
    h1 = jnp.dot(x_ref[...], w1_ref[...], preferred_element_type=f32) + b1_ref[...]
    h1 = jnp.maximum(h1, 0.0)

    # fused fc21|fc22: one (Hep, 2*Lp) matmul; lane-aligned slices for mu/logvar.
    ml = jnp.dot(h1.astype(cdt), w2_ref[...], preferred_element_type=f32) + b2_ref[...]
    mu = ml[:, :Lp]
    logvar = ml[:, Lp:2 * Lp]
    mu_ref[...] = mu
    logvar_ref[...] = logvar

    # reparameterize (training): z = eps * exp(0.5 * logvar) + mu   (all f32)
    if eps_ref is not None:
        z = eps_ref[...] * jnp.exp(0.5 * logvar) + mu
    else:                              # eval: z = mu
        z = mu

    # decode: h3 = relu(fc3(z)); out = fc4(h3)
    h3 = jnp.dot(z.astype(cdt), w3_ref[...], preferred_element_type=f32) + b3_ref[...]
    h3 = jnp.maximum(h3, 0.0)
    out_ref[...] = jnp.dot(h3.astype(cdt), w4_ref[...],
                           preferred_element_type=f32) + b4_ref[...]


def _vae_kernel_train(x_ref, eps_ref, *rest):
    _vae_body(x_ref, eps_ref, *rest)


def _vae_kernel_eval(x_ref, *rest):
    _vae_body(x_ref, None, *rest)


# ---------------------------------------------------------------------------
# Parameter init (PyTorch nn.Linear layout + init) and one-time preparation
# ---------------------------------------------------------------------------

def init_raw_params(key, emb_size, enc_hidden, dec_hidden, latent):
    """Raw params in PyTorch layout: weight (out, in), bias (out,)."""
    ks = jax.random.split(key, 5)

    def lin(k, out_f, in_f):
        k1, k2 = jax.random.split(k)
        bound = 1.0 / math.sqrt(in_f)
        w = jax.random.uniform(k1, (out_f, in_f), jnp.float32, -bound, bound)
        b = jax.random.uniform(k2, (out_f,), jnp.float32, -bound, bound)
        return w, b

    p = {}
    p["fc1_w"], p["fc1_b"] = lin(ks[0], enc_hidden, emb_size)
    p["fc21_w"], p["fc21_b"] = lin(ks[1], latent, enc_hidden)
    p["fc22_w"], p["fc22_b"] = lin(ks[2], latent, enc_hidden)
    p["fc3_w"], p["fc3_b"] = lin(ks[3], dec_hidden, latent)
    p["fc4_w"], p["fc4_b"] = lin(ks[4], emb_size, dec_hidden)
    return p


def prepare_params(p, emb_size, enc_hidden, dec_hidden, latent,
                   compute_dtype=jnp.bfloat16):
    """Transpose to (K, N), pad to lane multiples of 128, fuse fc21|fc22, ONCE.

    compute_dtype=bf16 (default) halves weight HBM traffic; f32 accumulation
    is kept inside the kernel.  Pass jnp.float32 for bit-faithful PyTorch math.
    Biases stay f32 (added to the f32 accumulator).
    """
    Ep = _round_up(emb_size, 128)
    Hep = _round_up(enc_hidden, 128)
    Hdp = _round_up(dec_hidden, 128)
    Lp = _round_up(latent, 128)

    def wT(w, Kp, Np):
        wt = jnp.asarray(w, jnp.float32).T                 # (in, out) = (K, N)
        wt = jnp.pad(wt, ((0, Kp - wt.shape[0]), (0, Np - wt.shape[1])))
        return wt.astype(compute_dtype)

    def bp(b, Np):
        b = jnp.asarray(b, jnp.float32).reshape(1, -1)
        return jnp.pad(b, ((0, 0), (0, Np - b.shape[1])))

    # fc21 and fc22 packed along N -> one matmul inside the kernel.
    w2 = jnp.concatenate([wT(p["fc21_w"], Hep, Lp), wT(p["fc22_w"], Hep, Lp)],
                         axis=1)
    b2 = jnp.concatenate([bp(p["fc21_b"], Lp), bp(p["fc22_b"], Lp)], axis=1)

    pp = dict(
        w1=wT(p["fc1_w"], Ep, Hep), b1=bp(p["fc1_b"], Hep),
        w2=w2, b2=b2,
        w3=wT(p["fc3_w"], Lp, Hdp), b3=bp(p["fc3_b"], Hdp),
        w4=wT(p["fc4_w"], Hdp, Ep), b4=bp(p["fc4_b"], Ep),
    )
    dims = dict(emb=emb_size, latent=latent)
    return pp, dims


# ---------------------------------------------------------------------------
# Forward (single fused pallas_call)
# ---------------------------------------------------------------------------

def vae_forward(pp, x, eps=None, *, dims, training=True):
    """x: (B, emb) f32; eps: (B, latent) f32 (training only) -> (recon, mu, logvar).

    NOTE: for repeated tiny-batch serving, concatenate several micro-batches
    along B before calling — the constant (0,0) weight index maps mean weights
    are DMA'd once per call, so a bigger M amortizes the weight traffic.
    """
    if training and eps is None:
        raise ValueError("training=True requires eps of shape (batch, latent)")

    B = x.shape[0]
    compute_dtype = pp["w1"].dtype

    # Padded dims, derived from the prepared weights.
    Ep, Hep = pp["w1"].shape
    Lp = pp["w2"].shape[1] // 2
    Hdp = pp["w3"].shape[1]

    tm = _choose_tm(B)
    Mp = _round_up(B, tm)
    grid = (Mp // tm,)

    x_pad = jnp.zeros((Mp, Ep), compute_dtype)
    x_pad = x_pad.at[:B, :x.shape[1]].set(x.astype(compute_dtype))

    # Grid-invariant weights/biases (index map is constant across M steps).
    weight_specs = [
        pl.BlockSpec((Ep, Hep), lambda i: (0, 0)),       # w1
        pl.BlockSpec((1, Hep), lambda i: (0, 0)),        # b1
        pl.BlockSpec((Hep, 2 * Lp), lambda i: (0, 0)),   # w2 (fc21|fc22 fused)
        pl.BlockSpec((1, 2 * Lp), lambda i: (0, 0)),     # b2
        pl.BlockSpec((Lp, Hdp), lambda i: (0, 0)),       # w3
        pl.BlockSpec((1, Hdp), lambda i: (0, 0)),        # b3
        pl.BlockSpec((Hdp, Ep), lambda i: (0, 0)),       # w4
        pl.BlockSpec((1, Ep), lambda i: (0, 0)),         # b4
    ]
    weight_args = (pp["w1"], pp["b1"], pp["w2"], pp["b2"],
                   pp["w3"], pp["b3"], pp["w4"], pp["b4"])

    if training:
        eps_pad = jnp.zeros((Mp, Lp), jnp.float32)
        eps_pad = eps_pad.at[:B, :eps.shape[1]].set(eps.astype(jnp.float32))
        kernel = _vae_kernel_train
        in_specs = [pl.BlockSpec((tm, Ep), lambda i: (i, 0)),   # x
                    pl.BlockSpec((tm, Lp), lambda i: (i, 0))    # eps
                    ] + weight_specs
        args = (x_pad, eps_pad) + weight_args
    else:
        # Inference path: no eps input / padding / DMA at all.
        kernel = _vae_kernel_eval
        in_specs = [pl.BlockSpec((tm, Ep), lambda i: (i, 0))] + weight_specs
        args = (x_pad,) + weight_args

    out_shapes = (jax.ShapeDtypeStruct((Mp, Ep), jnp.float32),   # recon
                  jax.ShapeDtypeStruct((Mp, Lp), jnp.float32),   # mu
                  jax.ShapeDtypeStruct((Mp, Lp), jnp.float32))   # logvar

    out_p, mu_p, logvar_p = pl.pallas_call(
        kernel,
        out_shape=out_shapes,
        grid_spec=pltpu.PrefetchScalarGridSpec(
            num_scalar_prefetch=0,
            grid=grid,
            in_specs=in_specs,
            out_specs=(
                pl.BlockSpec((tm, Ep), lambda i: (i, 0)),    # recon
                pl.BlockSpec((tm, Lp), lambda i: (i, 0)),    # mu
                pl.BlockSpec((tm, Lp), lambda i: (i, 0)),    # logvar
            )),
        compiler_params=pltpu.CompilerParams(
            dimension_semantics=("parallel",),
            vmem_limit_bytes=32 * 1024 * 1024),
    )(*args)

    E, L = dims["emb"], dims["latent"]
    # TODO(synk): PyTorch forward also does `print(z.size())` (debug-only side
    # effect) and tracks self.bce / self.kl outside forward; no compute impact.
    return out_p[:B, :E], mu_p[:B, :L], logvar_p[:B, :L]


# ---------------------------------------------------------------------------
# Pure-JAX reference mirroring the kernel's numerics (for correctness checks)
# ---------------------------------------------------------------------------

def vae_reference(p, x, eps=None, training=True, compute_dtype=jnp.float32):
    cdt = compute_dtype

    def mm(a, w):
        return jnp.dot(a.astype(cdt), jnp.asarray(w, jnp.float32).T.astype(cdt),
                       preferred_element_type=jnp.float32,
                       precision=jax.lax.Precision.HIGHEST)

    h1 = jax.nn.relu(mm(x, p["fc1_w"]) + p["fc1_b"])
    mu = mm(h1, p["fc21_w"]) + p["fc21_b"]
    logvar = mm(h1, p["fc22_w"]) + p["fc22_b"]
    z = eps * jnp.exp(0.5 * logvar) + mu if training else mu
    h3 = jax.nn.relu(mm(z, p["fc3_w"]) + p["fc3_b"])
    out = mm(h3, p["fc4_w"]) + p["fc4_b"]
    return out, mu, logvar


# ---------------------------------------------------------------------------

if __name__ == "__main__":
    # Module defaults: emb=784, enc/dec hidden=400, latent=20.
    emb_size, enc_hidden, dec_hidden, latent = 784, 400, 400, 20
    batch = 2

    key = jax.random.PRNGKey(0)
    pkey, xkey, ekey, xkey2, ekey2 = jax.random.split(key, 5)

    raw = init_raw_params(pkey, emb_size, enc_hidden, dec_hidden, latent)

    # Default (bf16 weights) and an f32-weight config for the tight check.
    pp_bf16, dims = prepare_params(raw, emb_size, enc_hidden, dec_hidden, latent)
    pp_f32, _ = prepare_params(raw, emb_size, enc_hidden, dec_hidden, latent,
                               compute_dtype=jnp.float32)

    x = jax.random.normal(xkey, (batch, emb_size), jnp.float32)
    eps = jax.random.normal(ekey, (batch, latent), jnp.float32)

    fwd_train = jax.jit(functools.partial(vae_forward, dims=dims, training=True))
    fwd_eval = jax.jit(functools.partial(vae_forward, dims=dims, training=False))

    # --- 1) bf16 weights (default), training=True ---------------------------
    recon, mu, logvar = fwd_train(pp_bf16, x, eps)
    jax.block_until_ready((recon, mu, logvar))
    assert recon.shape == (batch, emb_size)
    assert mu.shape == (batch, latent) and logvar.shape == (batch, latent)
    assert bool(jnp.all(jnp.isfinite(recon)))

    r_out, r_mu, r_lv = vae_reference(raw, x, eps, training=True,
                                      compute_dtype=jnp.bfloat16)
    assert float(jnp.max(jnp.abs(recon - r_out))) < 1e-2, "bf16 recon mismatch"
    assert float(jnp.max(jnp.abs(mu - r_mu))) < 1e-2, "bf16 mu mismatch"
    assert float(jnp.max(jnp.abs(logvar - r_lv))) < 1e-2, "bf16 logvar mismatch"

    # Loose sanity check against the pure-f32 PyTorch-equivalent math.
    f_out, f_mu, f_lv = vae_reference(raw, x, eps, training=True,
                                      compute_dtype=jnp.float32)
    assert float(jnp.max(jnp.abs(recon - f_out))) < 5e-2, "bf16 vs f32 drift"

    # --- 2) bf16 weights, inference path (no eps input) ---------------------
    recon_e, mu_e, logvar_e = fwd_eval(pp_bf16, x)
    jax.block_until_ready(recon_e)
    e_out, e_mu, e_lv = vae_reference(raw, x, training=False,
                                      compute_dtype=jnp.bfloat16)
    assert float(jnp.max(jnp.abs(recon_e - e_out))) < 1e-2, "eval recon mismatch"
    assert float(jnp.max(jnp.abs(mu_e - e_mu))) < 1e-2, "eval mu mismatch"
    assert float(jnp.max(jnp.abs(logvar_e - e_lv))) < 1e-2, "eval logvar mismatch"

    # --- 3) f32 weights, training=True (tight check) -------------------------
    recon_f, mu_f, logvar_f = fwd_train(pp_f32, x, eps)
    jax.block_until_ready(recon_f)
    assert float(jnp.max(jnp.abs(recon_f - f_out))) < 5e-3, "f32 recon mismatch"
    assert float(jnp.max(jnp.abs(mu_f - f_mu))) < 5e-3, "f32 mu mismatch"
    assert float(jnp.max(jnp.abs(logvar_f - f_lv))) < 5e-3, "f32 logvar mismatch"

    # --- 4) larger batch: exercises >=2 "parallel" M grid steps -------------
    big_b = 32
    xb = jax.random.normal(xkey2, (big_b, emb_size), jnp.float32)
    eb = jax.random.normal(ekey2, (big_b, latent), jnp.float32)
    recon_b, mu_b, logvar_b = fwd_train(pp_bf16, xb, eb)
    jax.block_until_ready(recon_b)
    b_out, b_mu, b_lv = vae_reference(raw, xb, eb, training=True,
                                      compute_dtype=jnp.bfloat16)
    assert recon_b.shape == (big_b, emb_size)
    assert float(jnp.max(jnp.abs(recon_b - b_out))) < 1e-2, "batched recon mismatch"
    assert bool(jnp.all(jnp.isfinite(recon_b)))

    print("KERNEL_OK")
</pallas_src>

<mosaic_0001>
module attributes {stable_mosaic.version = 11 : i64} {
  func.func @_vae_kernel_train(%arg0: i32, %arg1: memref<8x896xbf16, #tpu.memory_space<vmem>>, %arg2: memref<8x128xf32, #tpu.memory_space<vmem>>, %arg3: memref<896x512xbf16, #tpu.memory_space<vmem>>, %arg4: memref<1x512xf32, #tpu.memory_space<vmem>>, %arg5: memref<512x256xbf16, #tpu.memory_space<vmem>>, %arg6: memref<1x256xf32, #tpu.memory_space<vmem>>, %arg7: memref<128x512xbf16, #tpu.memory_space<vmem>>, %arg8: memref<1x512xf32, #tpu.memory_space<vmem>>, %arg9: memref<512x896xbf16, #tpu.memory_space<vmem>>, %arg10: memref<1x896xf32, #tpu.memory_space<vmem>>, %arg11: memref<8x896xf32, #tpu.memory_space<vmem>>, %arg12: memref<8x128xf32, #tpu.memory_space<vmem>>, %arg13: memref<8x128xf32, #tpu.memory_space<vmem>>) attributes {dimension_semantics = [#tpu.dimension_semantics<parallel>], iteration_bounds = array<i64: 1>, scalar_prefetch = 0 : i64, scratch_operands = 0 : i64, tpu.core_type = #tpu.core_type<tc>, window_params = [{transform_indices = @transform_0, window_bounds = array<i64: 8, 896>}, {transform_indices = @transform_1, window_bounds = array<i64: 8, 128>}, {pipeline_mode = #tpu.pipeline_mode<synchronous>, transform_indices = @transform_2, window_bounds = array<i64: 896, 512>}, {pipeline_mode = #tpu.pipeline_mode<synchronous>, transform_indices = @transform_3, window_bounds = array<i64: 1, 512>}, {pipeline_mode = #tpu.pipeline_mode<synchronous>, transform_indices = @transform_4, window_bounds = array<i64: 512, 256>}, {pipeline_mode = #tpu.pipeline_mode<synchronous>, transform_indices = @transform_5, window_bounds = array<i64: 1, 256>}, {pipeline_mode = #tpu.pipeline_mode<synchronous>, transform_indices = @transform_6, window_bounds = array<i64: 128, 512>}, {pipeline_mode = #tpu.pipeline_mode<synchronous>, transform_indices = @transform_7, window_bounds = array<i64: 1, 512>}, {pipeline_mode = #tpu.pipeline_mode<synchronous>, transform_indices = @transform_8, window_bounds = array<i64: 512, 896>}, {pipeline_mode = #tpu.pipeline_mode<synchronous>, transform_indices = @transform_9, window_bounds = array<i64: 1, 896>}, {transform_indices = @transform_10, window_bounds = array<i64: 8, 896>}, {transform_indices = @transform_11, window_bounds = array<i64: 8, 128>}, {transform_indices = @transform_12, window_bounds = array<i64: 8, 128>}]} {
    %c0 = arith.constant 0 : index
    %c0_0 = arith.constant 0 : index
    %0 = vector.load %arg1[%c0, %c0_0] : memref<8x896xbf16, #tpu.memory_space<vmem>>, vector<8x896xbf16>
    %c0_1 = arith.constant 0 : index
    %c0_2 = arith.constant 0 : index
    %1 = vector.load %arg3[%c0_1, %c0_2] : memref<896x512xbf16, #tpu.memory_space<vmem>>, vector<896x512xbf16>
    %cst = arith.constant dense<0.000000e+00> : vector<8x512xf32>
    %2 = tpu.matmul %0, %1, %cst {dimension_numbers = #tpu.dot_dimension_numbers<[1], [0], [0], [1], [0, 0, 1, 1], [], []>} : vector<8x896xbf16>, vector<896x512xbf16>, vector<8x512xf32> -> vector<8x512xf32>
    %c0_3 = arith.constant 0 : index
    %c0_4 = arith.constant 0 : index
    %3 = vector.load %arg4[%c0_3, %c0_4] : memref<1x512xf32, #tpu.memory_space<vmem>>, vector<1x512xf32>
    %4 = vector.broadcast %3 : vector<1x512xf32> to vector<8x512xf32>
    %5 = arith.addf %2, %4 : vector<8x512xf32>
    %cst_5 = arith.constant 0.000000e+00 : f32
    %6 = vector.broadcast %cst_5 : f32 to vector<8x512xf32>
    %7 = arith.maximumf %5, %6 : vector<8x512xf32>
    %8 = arith.truncf %7 : vector<8x512xf32> to vector<8x512xbf16>
    %c0_6 = arith.constant 0 : index
    %c0_7 = arith.constant 0 : index
    %9 = vector.load %arg5[%c0_6, %c0_7] : memref<512x256xbf16, #tpu.memory_space<vmem>>, vector<512x256xbf16>
    %cst_8 = arith.constant dense<0.000000e+00> : vector<8x256xf32>
    %10 = tpu.matmul %8, %9, %cst_8 {dimension_numbers = #tpu.dot_dimension_numbers<[1], [0], [0], [1], [0, 0, 1, 1], [], []>} : vector<8x512xbf16>, vector<512x256xbf16>, vector<8x256xf32> -> vector<8x256xf32>
    %c0_9 = arith.constant 0 : index
    %c0_10 = arith.constant 0 : index
    %11 = vector.load %arg6[%c0_9, %c0_10] : memref<1x256xf32, #tpu.memory_space<vmem>>, vector<1x256xf32>
    %12 = vector.broadcast %11 : vector<1x256xf32> to vector<8x256xf32>
    %13 = arith.addf %10, %12 : vector<8x256xf32>
    %14 = vector.extract_strided_slice %13 {offsets = [0, 0], sizes = [8, 128], strides = [1, 1]} : vector<8x256xf32> to vector<8x128xf32>
    %15 = vector.extract_strided_slice %13 {offsets = [0, 128], sizes = [8, 128], strides = [1, 1]} : vector<8x256xf32> to vector<8x128xf32>
    %c0_11 = arith.constant 0 : index
    %c0_12 = arith.constant 0 : index
    %16 = vector.load %arg12[%c0_11, %c0_12] : memref<8x128xf32, #tpu.memory_space<vmem>>, vector<8x128xf32>
    tpu.vector_store %arg12[%c0_11, %c0_12], %14 {strides = array<i32>} : memref<8x128xf32, #tpu.memory_space<vmem>>, vector<8x128xf32>,
    %c0_13 = arith.constant 0 : index
    %c0_14 = arith.constant 0 : index
    %17 = vector.load %arg13[%c0_13, %c0_14] : memref<8x128xf32, #tpu.memory_space<vmem>>, vector<8x128xf32>
    tpu.vector_store %arg13[%c0_13, %c0_14], %15 {strides = array<i32>} : memref<8x128xf32, #tpu.memory_space<vmem>>, vector<8x128xf32>,
    %c0_15 = arith.constant 0 : index
    %c0_16 = arith.constant 0 : index
    %18 = vector.load %arg2[%c0_15, %c0_16] : memref<8x128xf32, #tpu.memory_space<vmem>>, vector<8x128xf32>
    %cst_17 = arith.constant 5.000000e-01 : f32
    %19 = vector.broadcast %cst_17 : f32 to vector<8x128xf32>
    %20 = arith.mulf %19, %15 : vector<8x128xf32>
    %21 = math.exp %20 : vector<8x128xf32>
    %22 = arith.mulf %18, %21 : vector<8x128xf32>
    %23 = arith.addf %22, %14 : vector<8x128xf32>
    %24 = arith.truncf %23 : vector<8x128xf32> to vector<8x128xbf16>
    %c0_18 = arith.constant 0 : index
    %c0_19 = arith.constant 0 : index
    %25 = vector.load %arg7[%c0_18, %c0_19] : memref<128x512xbf16, #tpu.memory_space<vmem>>, vector<128x512xbf16>
    %cst_20 = arith.constant dense<0.000000e+00> : vector<8x512xf32>
    %26 = tpu.matmul %24, %25, %cst_20 {dimension_numbers = #tpu.dot_dimension_numbers<[1], [0], [0], [1], [0, 0, 1, 1], [], []>} : vector<8x128xbf16>, vector<128x512xbf16>, vector<8x512xf32> -> vector<8x512xf32>
    %c0_21 = arith.constant 0 : index
    %c0_22 = arith.constant 0 : index
    %27 = vector.load %arg8[%c0_21, %c0_22] : memref<1x512xf32, #tpu.memory_space<vmem>>, vector<1x512xf32>
    %28 = vector.broadcast %27 : vector<1x512xf32> to vector<8x512xf32>
    %29 = arith.addf %26, %28 : vector<8x512xf32>
    %cst_23 = arith.constant 0.000000e+00 : f32
    %30 = vector.broadcast %cst_23 : f32 to vector<8x512xf32>
    %31 = arith.maximumf %29, %30 : vector<8x512xf32>
    %32 = arith.truncf %31 : vector<8x512xf32> to vector<8x512xbf16>
    %c0_24 = arith.constant 0 : index
    %c0_25 = arith.constant 0 : index
    %33 = vector.load %arg9[%c0_24, %c0_25] : memref<512x896xbf16, #tpu.memory_space<vmem>>, vector<512x896xbf16>
    %cst_26 = arith.constant dense<0.000000e+00> : vector<8x896xf32>
    %34 = tpu.matmul %32, %33, %cst_26 {dimension_numbers = #tpu.dot_dimension_numbers<[1], [0], [0], [1], [0, 0, 1, 1], [], []>} : vector<8x512xbf16>, vector<512x896xbf16>, vector<8x896xf32> -> vector<8x896xf32>
    %c0_27 = arith.constant 0 : index
    %c0_28 = arith.constant 0 : index
    %35 = vector.load %arg10[%c0_27, %c0_28] : memref<1x896xf32, #tpu.memory_space<vmem>>, vector<1x896xf32>
    %36 = vector.broadcast %35 : vector<1x896xf32> to vector<8x896xf32>
    %37 = arith.addf %34, %36 : vector<8x896xf32>
    %c0_29 = arith.constant 0 : index
    %c0_30 = arith.constant 0 : index
    %38 = vector.load %arg11[%c0_29, %c0_30] : memref<8x896xf32, #tpu.memory_space<vmem>>, vector<8x896xf32>
    tpu.vector_store %arg11[%c0_29, %c0_30], %37 {strides = array<i32>} : memref<8x896xf32, #tpu.memory_space<vmem>>, vector<8x896xf32>,
    return
  }
  func.func @transform_0(%arg0: i32) -> (i32, i32) {
    %c0_i32 = arith.constant 0 : i32
    %c0_i32_0 = arith.constant 0 : i32
    return %arg0, %c0_i32 : i32, i32
  }
  func.func @transform_1(%arg0: i32) -> (i32, i32) {
    %c0_i32 = arith.constant 0 : i32
    %c0_i32_0 = arith.constant 0 : i32
    return %arg0, %c0_i32 : i32, i32
  }
  func.func @transform_2(%arg0: i32) -> (i32, i32) {
    %c0_i32 = arith.constant 0 : i32
    %c0_i32_0 = arith.constant 0 : i32
    %c0_i32_1 = arith.constant 0 : i32
    return %c0_i32, %c0_i32_0 : i32, i32
  }
  func.func @transform_3(%arg0: i32) -> (i32, i32) {
    %c0_i32 = arith.constant 0 : i32
    %c0_i32_0 = arith.constant 0 : i32
    %c0_i32_1 = arith.constant 0 : i32
    return %c0_i32, %c0_i32_0 : i32, i32
  }
  func.func @transform_4(%arg0: i32) -> (i32, i32) {
    %c0_i32 = arith.constant 0 : i32
    %c0_i32_0 = arith.constant 0 : i32
    %c0_i32_1 = arith.constant 0 : i32
    return %c0_i32, %c0_i32_0 : i32, i32
  }
  func.func @transform_5(%arg0: i32) -> (i32, i32) {
    %c0_i32 = arith.constant 0 : i32
    %c0_i32_0 = arith.constant 0 : i32
    %c0_i32_1 = arith.constant 0 : i32
    return %c0_i32, %c0_i32_0 : i32, i32
  }
  func.func @transform_6(%arg0: i32) -> (i32, i32) {
    %c0_i32 = arith.constant 0 : i32
    %c0_i32_0 = arith.constant 0 : i32
    %c0_i32_1 = arith.constant 0 : i32
    return %c0_i32, %c0_i32_0 : i32, i32
  }
  func.func @transform_7(%arg0: i32) -> (i32, i32) {
    %c0_i32 = arith.constant 0 : i32
    %c0_i32_0 = arith.constant 0 : i32
    %c0_i32_1 = arith.constant 0 : i32
    return %c0_i32, %c0_i32_0 : i32, i32
  }
  func.func @transform_8(%arg0: i32) -> (i32, i32) {
    %c0_i32 = arith.constant 0 : i32
    %c0_i32_0 = arith.constant 0 : i32
    %c0_i32_1 = arith.constant 0 : i32
    return %c0_i32, %c0_i32_0 : i32, i32
  }
  func.func @transform_9(%arg0: i32) -> (i32, i32) {
    %c0_i32 = arith.constant 0 : i32
    %c0_i32_0 = arith.constant 0 : i32
    %c0_i32_1 = arith.constant 0 : i32
    return %c0_i32, %c0_i32_0 : i32, i32
  }
  func.func @transform_10(%arg0: i32) -> (i32, i32) {
    %c0_i32 = arith.constant 0 : i32
    %c0_i32_0 = arith.constant 0 : i32
    return %arg0, %c0_i32 : i32, i32
  }
  func.func @transform_11(%arg0: i32) -> (i32, i32) {
    %c0_i32 = arith.constant 0 : i32
    %c0_i32_0 = arith.constant 0 : i32
    return %arg0, %c0_i32 : i32, i32
  }
  func.func @transform_12(%arg0: i32) -> (i32, i32) {
    %c0_i32 = arith.constant 0 : i32
    %c0_i32_0 = arith.constant 0 : i32
    return %arg0, %c0_i32 : i32, i32
  }
}

</mosaic_0001>

<bundles_post_ra>
// kernel: vae_forward.1
= control target key start
LH: loop header
LB: loop body
LE: loop exit
PB: predicated region body
PF: predicated region fallthrough
CT: control target
= control target key end

     0   :  { %18 = vsyncpa [#allocation3], 0  ;;  %s6244_s0 = inlined_call_operand.vmem [shape: bf16[8,896], index: 0, kind: input, shape index: {}]   ;;  %s6245_s1 = inlined_call_operand.vmem [shape: f32[8,128], index: 1, kind: input, shape index: {}]   ;;  %s6246_s2 = inlined_call_operand.hbm [shape: bf16[896,512], index: 2, kind: input, shape index: {}]   ;;  %s6247_s3 = inlined_call_operand.vmem [shape: f32[1,512], index: 3, kind: input, shape index: {}]   ;;  %s6248_s4 = inlined_call_operand.hbm [shape: bf16[512,256], index: 4, kind: input, shape index: {}]   ;;  %s6249_s5 = inlined_call_operand.vmem [shape: f32[1,256], index: 5, kind: input, shape index: {}]   ;;  %s6250_s6 = inlined_call_operand.hbm [shape: bf16[128,512], index: 6, kind: input, shape index: {}]   ;;  %s6251_s7 = inlined_call_operand.vmem [shape: f32[1,512], index: 7, kind: input, shape index: {}]   ;;  %s6252_s8 = inlined_call_operand.hbm [shape: bf16[512,896], index: 8, kind: input, shape index: {}]   ;;  %s6253_s9 = inlined_call_operand.vmem [shape: f32[1,896], index: 9, kind: input, shape index: {}]   ;;  %s6254_s10 = inlined_call_operand.vmem [shape: f32[8,896], index: 10, kind: output, shape index: {0}]   ;;  %s6255_s11 = inlined_call_operand.vmem [shape: f32[8,128], index: 11, kind: output, shape index: {1}]   ;;  %s6256_s12 = inlined_call_operand.vmem [shape: f32[8,128], index: 12, kind: output, shape index: {2}]  }
   0x1   :  { %19 = vsyncpa [#allocation5], 0 }
   0x2   :  { %20 = vsyncpa [#allocation8], 0  ;;  %s5970_s21 = smov [#allocation4]   ;;  %s5876_s25 = scalar_lea.hbm %s6248_s4, 8192 }
   0x3   :  { %s44_s22 = sshll.u32 %s5970_s21, 4  ;;  %p5877_p0 = scmp.ne.s32.totalorder %s6248_s4, %s5876_s25  ;;  %s45_s22 = int_to_ptr.vmem [resolvable:$true] %s44_s22 }
   0x4   :  { %p5880_p1 = scmp.lt.u32.totalorder %s5876_s25, %s6248_s4 }
   0x6   :  { %p5882_p2 = pnand %p5880_p1, %p5877_p0 }
   0x8   :  { %5885 = shalt.err (!%p5882_p2)
}
   0x9   :  { %s5886_s30 = scalar_lea.vmem %s45_s22, 8192  ;;  %p5891_p4 = scmp.lt.s32.totalorder %s45_s22, %s45_s22 }
   0xa   :  { %p5887_p3 = scmp.ne.s32.totalorder %s45_s22, %s5886_s30  ;;  %p5892_p5 = scmp.lt.s32.totalorder %s5886_s30, %s5886_s30 }
   0xc   :  { %p5893_p6 = por %p5892_p5, %p5891_p4 }
   0xe   :  { %p5894_p7 = pnand %p5893_p6, %p5887_p3 }
  0x10   :  { %5897 = shalt.err (!%p5894_p7)
}
  0x11   :  { %s5971_s13 = smov 128   ;;  %s5972_s14 = smov 8  }
  0x12   :  { %50 = dma.hbm_to_vmem [thread:$0]  %s6248_s4, 8192, %s45_s22, [#allocation5], %s5971_s13, %s5971_s13, %s5972_s14  }
  0x13   :  { %s5973_s17 = smov [#allocation2]   ;;  %s5898_s21 = scalar_lea.hbm %s6246_s2, 28672 }
  0x14   :  { %s30_s18 = sshll.u32 %s5973_s17, 4  ;;  %p5899_p8 = scmp.ne.s32.totalorder %s6246_s2, %s5898_s21  ;;  %s31_s18 = int_to_ptr.vmem [resolvable:$true] %s30_s18 }
  0x15   :  { %p5902_p9 = scmp.lt.u32.totalorder %s5898_s21, %s6246_s2 }
  0x17   :  { %p5904_p10 = pnand %p5902_p9, %p5899_p8 }
  0x19   :  { %5907 = shalt.err (!%p5904_p10)
}
  0x1a   :  { %s5908_s27 = scalar_lea.vmem %s31_s18, 28672  ;;  %p5913_p12 = scmp.lt.s32.totalorder %s31_s18, %s31_s18 }
  0x1b   :  { %p5909_p11 = scmp.ne.s32.totalorder %s31_s18, %s5908_s27  ;;  %p5914_p13 = scmp.lt.s32.totalorder %s5908_s27, %s5908_s27 }
  0x1d   :  { %p5915_p0 = por %p5914_p13, %p5913_p12 }
  0x1f   :  { %p5916_p1 = pnand %p5915_p0, %p5909_p11 }
  0x21   :  { %5919 = shalt.err (!%p5916_p1)
}
  0x22   :  { %s5974_s4 = smov 256   ;;  %s5975_s22 = smov 16  }
  0x23   :  { %36 = dma.hbm_to_vmem [thread:$0]  %s6246_s2, 28672, %s31_s18, [#allocation3], %s5974_s4, %s5974_s4, %s5975_s22  }
  0x24   :  { %s5976_s30 = smov [#allocation6]   ;;  %s5977_s14 = smov [#allocation7]  }
  0x25   :  { %s58_s13 = sshll.u32 %s5976_s30, 4  ;;  %s72_s15 = sshll.u32 %s5977_s14, 4  ;;  %s59_s13 = int_to_ptr.vmem [resolvable:$true] %s58_s13  ;;  %s6070_s15 = int_to_ptr.vmem [resolvable:$true] %s72_s15 }
  0x26   :  { %s5920_s19 = scalar_lea.hbm %s6250_s6, 4096 }
  0x27   :  { %p5921_p2 = scmp.ne.s32.totalorder %s6250_s6, %s5920_s19  ;;  %p5924_p3 = scmp.lt.u32.totalorder %s5920_s19, %s6250_s6 }
  0x29   :  { %p5926_p4 = pnand %p5924_p3, %p5921_p2 }
  0x2b   :  { %5929 = shalt.err (!%p5926_p4)
}
  0x2c   :  { %s5930_s2 = scalar_lea.vmem %s59_s13, 4096  ;;  %p5935_p6 = scmp.lt.s32.totalorder %s59_s13, %s59_s13 }
  0x2d   :  { %p5931_p5 = scmp.ne.s32.totalorder %s59_s13, %s5930_s2  ;;  %p5936_p7 = scmp.lt.s32.totalorder %s5930_s2, %s5930_s2 }
  0x2f   :  { %p5937_p8 = por %p5936_p7, %p5935_p6 }
  0x31   :  { %p5938_p9 = pnand %p5937_p8, %p5931_p5 }
  0x33   :  { %5941 = shalt.err (!%p5938_p9)
}
  0x34   :  { %64 = dma.hbm_to_vmem [thread:$0]  %s6250_s6, 4096, %s59_s13, [#allocation5], %s5974_s4, %s5974_s4, %s5975_s22  }
  0x35   :  { %s5942_s28 = scalar_lea.hbm %s6252_s8, 28672 }
  0x36   :  { %p5943_p10 = scmp.ne.s32.totalorder %s6252_s8, %s5942_s28  ;;  %p5946_p11 = scmp.lt.u32.totalorder %s5942_s28, %s6252_s8 }
  0x38   :  { %p5948_p12 = pnand %p5946_p11, %p5943_p10 }
  0x3a   :  { %5951 = shalt.err (!%p5948_p12)
}
  0x3b   :  { %s5952_s17 = scalar_lea.vmem %s6070_s15, 28672  ;;  %p5957_p0 = scmp.lt.s32.totalorder %s6070_s15, %s6070_s15 }
  0x3c   :  { %p5953_p13 = scmp.ne.s32.totalorder %s6070_s15, %s5952_s17  ;;  %p5958_p1 = scmp.lt.s32.totalorder %s5952_s17, %s5952_s17 }
  0x3e   :  { %p5959_p2 = por %p5958_p1, %p5957_p0 }
  0x40   :  { %p5960_p3 = pnand %p5959_p2, %p5953_p13 }
  0x42   :  { %5963 = shalt.err (!%p5960_p3)
}
  0x43   :  { %s5978_s6 = smov 448   ;;  %s5979_s4 = smov 28  }
  0x44   :  { %78 = dma.hbm_to_vmem [thread:$0]  %s6252_s8, 28672, %s6070_s15, [#allocation8], %s5978_s6, %s5978_s6, %s5979_s4  }
  0x45   :  { %5964 = dma.done.wait [#allocation3], 28672  }
  0x46   :  { %5965 = vsyncadd [#allocation3], 4294938624 }
  0x47   :  { %5966 = dma.done.wait [#allocation5], 12288  }
  0x48   :  { %5967 = vsyncadd [#allocation5], 4294955008 }
  0x49   :  { %5968 = dma.done.wait [#allocation8], 28672  }
  0x4a   :  { %5969 = vsyncadd [#allocation8], 4294938624  ;;  %v5067_v0 = vld [vmem:[#allocation2 + $0x4] ss:$16 sps:$4 sm:$0xff]   ;;  %v5069_v1 = vld [vmem:[#allocation2 + $0xc] ss:$16 sps:$4 sm:$0xff]  }
  0x4b   :  { %1489 = vmatprep.subr.bf16.mxu0 %v5067_v0  ;;  %v5071_v2 = vld [vmem:[#allocation2] ss:$16 sps:$4 sm:$0xff]   ;;  %v5072_v3 = vld [vmem:[#allocation2 + $0x8] ss:$16 sps:$4 sm:$0xff]   ;;  %1653 = vmatprep.subr.bf16.mxu1 %v5069_v1  ;;  %v5073_v4 = vld [vmem:[#allocation2 + $0x24] ss:$16 sps:$4 sm:$0xff]  }
  0x4c   :  { %1490 = vmatpush1.bf16.msra.mxu0 %v5071_v2  ;;  %1654 = vmatpush1.bf16.msra.mxu1 %v5072_v3  ;;  %v5075_v5 = vld [vmem:[#allocation2 + $0x2c] ss:$16 sps:$4 sm:$0xff]   ;;  %v5077_v6 = vld [vmem:[#allocation2 + $0x20] ss:$16 sps:$4 sm:$0xff]   ;;  %v5078_v7 = vld [vmem:[#allocation2 + $0x28] ss:$16 sps:$4 sm:$0xff]  }
  0x4d   :  { %1491 = vmatprep.subr.bf16.mxu0 %v5073_v4  ;;  %1655 = vmatprep.subr.bf16.mxu1 %v5075_v5  ;;  %v5079_v8 = vld [vmem:[#allocation2 + $0x44] ss:$16 sps:$4 sm:$0xff]   ;;  %v5081_v9 = vld [vmem:[#allocation2 + $0x4c] ss:$16 sps:$4 sm:$0xff]   ;;  %v5083_v10 = vld [vmem:[#allocation2 + $0x40] ss:$16 sps:$4 sm:$0xff]  }
  0x4e   :  { %v5084_v11 = vld [vmem:[#allocation2 + $0x48] ss:$16 sps:$4 sm:$0xff]   ;;  %v5085_v12 = vld [vmem:[#allocation2 + $0x64] ss:$16 sps:$4 sm:$0xff]   ;;  %v5087_v13 = vld [vmem:[#allocation2 + $0x6c] ss:$16 sps:$4 sm:$0xff]  }
  0x4f   :  { %v5089_v14 = vld [vmem:[#allocation2 + $0x60] ss:$16 sps:$4 sm:$0xff]   ;;  %v5090_v15 = vld [vmem:[#allocation2 + $0x68] ss:$16 sps:$4 sm:$0xff]   ;;  %v5091_v16 = vld [vmem:[#allocation2 + $0x84] ss:$16 sps:$4 sm:$0xff]  }
  0x50   :  { %1492 = vmatpush1.bf16.msra.mxu0 %v5077_v6  ;;  %1656 = vmatpush1.bf16.msra.mxu1 %v5078_v7  ;;  %v5093_v17 = vld [vmem:[#allocation2 + $0x8c] ss:$16 sps:$4 sm:$0xff]   ;;  %v5095_v18 = vld [vmem:[#allocation2 + $0x80] ss:$16 sps:$4 sm:$0xff]   ;;  %v5096_v19 = vld [vmem:[#allocation2 + $0x88] ss:$16 sps:$4 sm:$0xff]  }
  0x51   :  { %1493 = vmatprep.subr.bf16.mxu0 %v5079_v8  ;;  %1657 = vmatprep.subr.bf16.mxu1 %v5081_v9  ;;  %v5097_v20 = vld [vmem:[#allocation2 + $0xa4] ss:$16 sps:$4 sm:$0xff]   ;;  %v5099_v21 = vld [vmem:[#allocation2 + $0xac] ss:$16 sps:$4 sm:$0xff]   ;;  %v5101_v22 = vld [vmem:[#allocation2 + $0xa0] ss:$16 sps:$4 sm:$0xff]  }
  0x52   :  { %v5102_v23 = vld [vmem:[#allocation2 + $0xa8] ss:$16 sps:$4 sm:$0xff]   ;;  %v5103_v24 = vld [vmem:[#allocation2 + $0xc4] ss:$16 sps:$4 sm:$0xff]   ;;  %v5105_v25 = vld [vmem:[#allocation2 + $0xcc] ss:$16 sps:$4 sm:$0xff]  }
  0x53   :  { %v5107_v26 = vld [vmem:[#allocation2 + $0xc0] ss:$16 sps:$4 sm:$0xff]   ;;  %v5108_v27 = vld [vmem:[#allocation2 + $0xc8] ss:$16 sps:$4 sm:$0xff]   ;;  %v5109_v28 = vld [vmem:[#allocation2 + $0xe4] ss:$16 sps:$4 sm:$0xff]  }
  0x54   :  { %1494 = vmatpush1.bf16.msra.mxu0 %v5083_v10  ;;  %1658 = vmatpush1.bf16.msra.mxu1 %v5084_v11  ;;  %v5111_v29 = vld [vmem:[#allocation2 + $0xec] ss:$16 sps:$4 sm:$0xff]   ;;  %v5113_v30 = vld [vmem:[#allocation2 + $0xe0] ss:$16 sps:$4 sm:$0xff]   ;;  %v5114_v31 = vld [vmem:[#allocation2 + $0xe8] ss:$16 sps:$4 sm:$0xff]  }
  0x55   :  { %1495 = vmatprep.subr.bf16.mxu0 %v5085_v12  ;;  %1659 = vmatprep.subr.bf16.mxu1 %v5087_v13  ;;  %v5115_v32 = vld [vmem:[#allocation2 + $0x104] ss:$16 sps:$4 sm:$0xff]   ;;  %v5117_v33 = vld [vmem:[#allocation2 + $0x10c] ss:$16 sps:$4 sm:$0xff]   ;;  %v5119_v34 = vld [vmem:[#allocation2 + $0x100] ss:$16 sps:$4 sm:$0xff]  }
  0x56   :  { %v5120_v35 = vld [vmem:[#allocation2 + $0x108] ss:$16 sps:$4 sm:$0xff]   ;;  %v5121_v36 = vld [vmem:[#allocation2 + $0x124] ss:$16 sps:$4 sm:$0xff]   ;;  %v5123_v37 = vld [vmem:[#allocation2 + $0x12c] ss:$16 sps:$4 sm:$0xff]  }
  0x57   :  { %v5125_v38 = vld [vmem:[#allocation2 + $0x120] ss:$16 sps:$4 sm:$0xff]   ;;  %v5126_v39 = vld [vmem:[#allocation2 + $0x128] ss:$16 sps:$4 sm:$0xff]   ;;  %v5127_v40 = vld [vmem:[#allocation2 + $0x144] ss:$16 sps:$4 sm:$0xff]  }
  0x58   :  { %1496 = vmatpush1.bf16.msra.mxu0 %v5089_v14  ;;  %1660 = vmatpush1.bf16.msra.mxu1 %v5090_v15  ;;  %v5129_v41 = vld [vmem:[#allocation2 + $0x14c] ss:$16 sps:$4 sm:$0xff]   ;;  %v5131_v42 = vld [vmem:[#allocation2 + $0x140] ss:$16 sps:$4 sm:$0xff]   ;;  %v5132_v43 = vld [vmem:[#allocation2 + $0x148] ss:$16 sps:$4 sm:$0xff]  }
  0x59   :  { %1497 = vmatprep.subr.bf16.mxu0 %v5091_v16  ;;  %1661 = vmatprep.subr.bf16.mxu1 %v5093_v17  ;;  %v5133_v44 = vld [vmem:[#allocation2 + $0x164] ss:$16 sps:$4 sm:$0xff]   ;;  %v5135_v45 = vld [vmem:[#allocation2 + $0x16c] ss:$16 sps:$4 sm:$0xff]   ;;  %v5137_v47 = vld [vmem:[#allocation2 + $0x160] ss:$16 sps:$4 sm:$0xff]  }
  0x5a   :  { %v94_v46 = vld [vmem:[%s6244_s0] sm:$0xff]  ;;  %v5138_v49 = vld [vmem:[#allocation2 + $0x168] ss:$16 sps:$4 sm:$0xff]   ;;  %v5141_v51 = vld [vmem:[#allocation2 + $0x18c] ss:$16 sps:$4 sm:$0xff]  }
  0x5b   :  { %v4410_v48 = vcombine.high %v94_v46, %v94_v46  ;;  %v5139_v50 = vld [vmem:[#allocation2 + $0x184] ss:$16 sps:$4 sm:$0xff]   ;;  %v5143_v52 = vld [vmem:[#allocation2 + $0x180] ss:$16 sps:$4 sm:$0xff]   ;;  %v5144_v53 = vld [vmem:[#allocation2 + $0x188] ss:$16 sps:$4 sm:$0xff]   ;;  %v4409_v4 = vcombine.low %v94_v46, %v94_v46 }
  0x5c   :  { %1498 = vmatpush1.bf16.msra.mxu0 %v5095_v18  ;;  %1662 = vmatpush1.bf16.msra.mxu1 %v5096_v19  ;;  %v5145_v54 = vld [vmem:[#allocation2 + $0x1a4] ss:$16 sps:$4 sm:$0xff]   ;;  %v5147_v55 = vld [vmem:[#allocation2 + $0x1ac] ss:$16 sps:$4 sm:$0xff]   ;;  %v5149_v56 = vld [vmem:[#allocation2 + $0x1a0] ss:$16 sps:$4 sm:$0xff]  }
  0x5d   :  { %1499 = vmatprep.subr.bf16.mxu0 %v5097_v20  ;;  %1663 = vmatprep.subr.bf16.mxu1 %v5099_v21  ;;  %v5150_v57 = vld [vmem:[#allocation2 + $0x1a8] ss:$16 sps:$4 sm:$0xff]   ;;  %v5151_v58 = vld [vmem:[#allocation2 + $0x1c4] ss:$16 sps:$4 sm:$0xff]   ;;  %v5153_v59 = vld [vmem:[#allocation2 + $0x1cc] ss:$16 sps:$4 sm:$0xff]  }
  0x5e   :  { %1521 = vmatprep.mubr.bf16.mxu0 %v4410_v48  ;;  %1685 = vmatprep.mubr.bf16.mxu1 %v4410_v48  ;;  %v5155_v60 = vld [vmem:[#allocation2 + $0x1c0] ss:$16 sps:$4 sm:$0xff]   ;;  %v5156_v61 = vld [vmem:[#allocation2 + $0x1c8] ss:$16 sps:$4 sm:$0xff]   ;;  %v5157_v62 = vld [vmem:[#allocation2 + $0x1e4] ss:$16 sps:$4 sm:$0xff]  }
  0x5f   :  { %v5159_v63 = vld [vmem:[#allocation2 + $0x1ec] ss:$16 sps:$4 sm:$0xff]   ;;  %v5161_v0 = vld [vmem:[#allocation2 + $0x1e0] ss:$16 sps:$4 sm:$0xff]   ;;  %v5162_v1 = vld [vmem:[#allocation2 + $0x1e8] ss:$16 sps:$4 sm:$0xff]  }
  0x60   :  { %1500 = vmatpush1.bf16.msra.mxu0 %v5101_v22  ;;  %1664 = vmatpush1.bf16.msra.mxu1 %v5102_v23  ;;  %v5167_v2 = vld [vmem:[#allocation2 + $0x204] ss:$16 sps:$4 sm:$0xff]   ;;  %v5170_v3 = vld [vmem:[#allocation2 + $0x20c] ss:$16 sps:$4 sm:$0xff]   ;;  %v5165_v5 = vld [vmem:[#allocation2 + $0x200] ss:$16 sps:$4 sm:$0xff]  }
  0x61   :  { %1501 = vmatprep.subr.bf16.mxu0 %v5103_v24  ;;  %1665 = vmatprep.subr.bf16.mxu1 %v5105_v25  ;;  %v5168_v6 = vld [vmem:[#allocation2 + $0x208] ss:$16 sps:$4 sm:$0xff]   ;;  %v5173_v7 = vld [vmem:[#allocation2 + $0x224] ss:$16 sps:$4 sm:$0xff]   ;;  %v5176_v8 = vld [vmem:[#allocation2 + $0x22c] ss:$16 sps:$4 sm:$0xff]  }
  0x62   :  { %v5171_v9 = vld [vmem:[#allocation2 + $0x220] ss:$16 sps:$4 sm:$0xff]   ;;  %v5174_v10 = vld [vmem:[#allocation2 + $0x228] ss:$16 sps:$4 sm:$0xff]   ;;  %v5179_v11 = vld [vmem:[#allocation2 + $0x244] ss:$16 sps:$4 sm:$0xff]  }
  0x63   :  { %v5182_v12 = vld [vmem:[#allocation2 + $0x24c] ss:$16 sps:$4 sm:$0xff]   ;;  %v5177_v13 = vld [vmem:[#allocation2 + $0x240] ss:$16 sps:$4 sm:$0xff]   ;;  %v5180_v14 = vld [vmem:[#allocation2 + $0x248] ss:$16 sps:$4 sm:$0xff]  }
  0x64   :  { %1502 = vmatpush1.bf16.msra.mxu0 %v5107_v26  ;;  %1666 = vmatpush1.bf16.msra.mxu1 %v5108_v27  ;;  %v5185_v15 = vld [vmem:[#allocation2 + $0x264] ss:$16 sps:$4 sm:$0xff]   ;;  %v5188_v16 = vld [vmem:[#allocation2 + $0x26c] ss:$16 sps:$4 sm:$0xff]   ;;  %v5183_v17 = vld [vmem:[#allocation2 + $0x260] ss:$16 sps:$4 sm:$0xff]  }
  0x65   :  { %1503 = vmatprep.subr.bf16.mxu0 %v5109_v28  ;;  %1667 = vmatprep.subr.bf16.mxu1 %v5111_v29  ;;  %v5186_v18 = vld [vmem:[#allocation2 + $0x268] ss:$16 sps:$4 sm:$0xff]   ;;  %v5191_v19 = vld [vmem:[#allocation2 + $0x284] ss:$16 sps:$4 sm:$0xff]   ;;  %v5194_v20 = vld [vmem:[#allocation2 + $0x28c] ss:$16 sps:$4 sm:$0xff]  }
  0x66   :  { %v5189_v21 = vld [vmem:[#allocation2 + $0x280] ss:$16 sps:$4 sm:$0xff]   ;;  %v5192_v22 = vld [vmem:[#allocation2 + $0x288] ss:$16 sps:$4 sm:$0xff]   ;;  %v5197_v23 = vld [vmem:[#allocation2 + $0x2a4] ss:$16 sps:$4 sm:$0xff]  }
  0x67   :  { %v5200_v24 = vld [vmem:[#allocation2 + $0x2ac] ss:$16 sps:$4 sm:$0xff]   ;;  %v5195_v25 = vld [vmem:[#allocation2 + $0x2a0] ss:$16 sps:$4 sm:$0xff]   ;;  %v5198_v26 = vld [vmem:[#allocation2 + $0x2a8] ss:$16 sps:$4 sm:$0xff]  }
  0x68   :  { %1504 = vmatpush1.bf16.msra.mxu0 %v5113_v30  ;;  %1668 = vmatpush1.bf16.msra.mxu1 %v5114_v31  ;;  %v5203_v27 = vld [vmem:[#allocation2 + $0x2c4] ss:$16 sps:$4 sm:$0xff]   ;;  %v5206_v28 = vld [vmem:[#allocation2 + $0x2cc] ss:$16 sps:$4 sm:$0xff]   ;;  %v5201_v31 = vld [vmem:[#allocation2 + $0x2c0] ss:$16 sps:$4 sm:$0xff]  }
  0x69   :  { %1505 = vmatprep.subr.bf16.mxu0 %v5115_v32  ;;  %1669 = vmatprep.subr.bf16.mxu1 %v5117_v33  ;;  %v6107_v29 = vld [vmem:[%s6244_s0 + $0x8] sm:$0xff]  ;;  %v5209_v33 = vld [vmem:[#allocation2 + $0x2e4] ss:$16 sps:$4 sm:$0xff]  }
  0x6a   :  { %v4412_v30 = vcombine.high %v6107_v29, %v6107_v29  ;;  %v5204_v32 = vld [vmem:[#allocation2 + $0x2c8] ss:$16 sps:$4 sm:$0xff]   ;;  %v5230_v46 = vld [vmem:[#allocation2 + $0x34c] ss:$16 sps:$4 sm:$0xff]  }
  0x6b   :  { %v5228_v48 = vld [vmem:[#allocation2 + $0x348] ss:$16 sps:$4 sm:$0xff]  }
  0x6c   :  { %1506 = vmatpush1.bf16.msra.mxu0 %v5119_v34  ;;  %1670 = vmatpush1.bf16.msra.mxu1 %v5120_v35  ;;  %v5212_v34 = vld [vmem:[#allocation2 + $0x2ec] ss:$16 sps:$4 sm:$0xff]   ;;  %v5207_v35 = vld [vmem:[#allocation2 + $0x2e0] ss:$16 sps:$4 sm:$0xff]  }
  0x6d   :  { %1507 = vmatprep.subr.bf16.mxu0 %v5121_v36  ;;  %1671 = vmatprep.subr.bf16.mxu1 %v5123_v37  ;;  %v5210_v36 = vld [vmem:[#allocation2 + $0x2e8] ss:$16 sps:$4 sm:$0xff]   ;;  %v5215_v37 = vld [vmem:[#allocation2 + $0x304] ss:$16 sps:$4 sm:$0xff]  }
  0x70   :  { %1508 = vmatpush1.bf16.msra.mxu0 %v5125_v38  ;;  %1672 = vmatpush1.bf16.msra.mxu1 %v5126_v39  ;;  %v5218_v38 = vld [vmem:[#allocation2 + $0x30c] ss:$16 sps:$4 sm:$0xff]   ;;  %v5213_v39 = vld [vmem:[#allocation2 + $0x300] ss:$16 sps:$4 sm:$0xff]  }
  0x71   :  { %1509 = vmatprep.subr.bf16.mxu0 %v5127_v40  ;;  %1673 = vmatprep.subr.bf16.mxu1 %v5129_v41  ;;  %v5216_v40 = vld [vmem:[#allocation2 + $0x308] ss:$16 sps:$4 sm:$0xff]   ;;  %v5221_v41 = vld [vmem:[#allocation2 + $0x324] ss:$16 sps:$4 sm:$0xff]  }
  0x74   :  { %1510 = vmatpush1.bf16.msra.mxu0 %v5131_v42  ;;  %1674 = vmatpush1.bf16.msra.mxu1 %v5132_v43  ;;  %v5224_v42 = vld [vmem:[#allocation2 + $0x32c] ss:$16 sps:$4 sm:$0xff]   ;;  %v5219_v43 = vld [vmem:[#allocation2 + $0x320] ss:$16 sps:$4 sm:$0xff]  }
  0x75   :  { %1511 = vmatprep.subr.bf16.mxu0 %v5133_v44  ;;  %1675 = vmatprep.subr.bf16.mxu1 %v5135_v45  ;;  %v5222_v44 = vld [vmem:[#allocation2 + $0x328] ss:$16 sps:$4 sm:$0xff]   ;;  %v5227_v45 = vld [vmem:[#allocation2 + $0x344] ss:$16 sps:$4 sm:$0xff]  }
  0x78   :  { %1512 = vmatpush1.bf16.msra.mxu0 %v5137_v47  ;;  %1676 = vmatpush1.bf16.msra.mxu1 %v5138_v49  ;;  %v5225_v47 = vld [vmem:[#allocation2 + $0x340] ss:$16 sps:$4 sm:$0xff]   ;;  %v5233_v49 = vld [vmem:[#allocation2 + $0x364] ss:$16 sps:$4 sm:$0xff]  }
  0x79   :  { %1513 = vmatprep.subr.bf16.mxu0 %v5139_v50  ;;  %1677 = vmatprep.subr.bf16.mxu1 %v5141_v51  ;;  %v5236_v50 = vld [vmem:[#allocation2 + $0x36c] ss:$16 sps:$4 sm:$0xff]   ;;  %v5231_v51 = vld [vmem:[#allocation2 + $0x360] ss:$16 sps:$4 sm:$0xff]  }
  0x7c   :  { %1514 = vmatpush1.bf16.msra.mxu0 %v5143_v52  ;;  %1678 = vmatpush1.bf16.msra.mxu1 %v5144_v53  ;;  %v5234_v52 = vld [vmem:[#allocation2 + $0x368] ss:$16 sps:$4 sm:$0xff]   ;;  %v5239_v53 = vld [vmem:[#allocation2 + $0x384] ss:$16 sps:$4 sm:$0xff]  }
  0x7d   :  { %1515 = vmatprep.subr.bf16.mxu0 %v5145_v54  ;;  %1679 = vmatprep.subr.bf16.mxu1 %v5147_v55  ;;  %v5242_v54 = vld [vmem:[#allocation2 + $0x38c] ss:$16 sps:$4 sm:$0xff]   ;;  %v5237_v55 = vld [vmem:[#allocation2 + $0x380] ss:$16 sps:$4 sm:$0xff]  }
  0x80   :  { %1516 = vmatpush1.bf16.msra.mxu0 %v5149_v56  ;;  %1680 = vmatpush1.bf16.msra.mxu1 %v5150_v57  ;;  %v5240_v56 = vld [vmem:[#allocation2 + $0x388] ss:$16 sps:$4 sm:$0xff]   ;;  %v5245_v57 = vld [vmem:[#allocation2 + $0x3a4] ss:$16 sps:$4 sm:$0xff]  }
  0x81   :  { %1517 = vmatprep.subr.bf16.mxu0 %v5151_v58  ;;  %1681 = vmatprep.subr.bf16.mxu1 %v5153_v59  ;;  %v5248_v58 = vld [vmem:[#allocation2 + $0x3ac] ss:$16 sps:$4 sm:$0xff]   ;;  %v5243_v59 = vld [vmem:[#allocation2 + $0x3a0] ss:$16 sps:$4 sm:$0xff]  }
  0x84   :  { %1518 = vmatpush1.bf16.msra.mxu0 %v5155_v60  ;;  %1682 = vmatpush1.bf16.msra.mxu1 %v5156_v61  ;;  %v5246_v60 = vld [vmem:[#allocation2 + $0x3a8] ss:$16 sps:$4 sm:$0xff]   ;;  %v5251_v61 = vld [vmem:[#allocation2 + $0x3c4] ss:$16 sps:$4 sm:$0xff]  }
  0x85   :  { %1519 = vmatprep.subr.bf16.mxu0 %v5157_v62  ;;  %1683 = vmatprep.subr.bf16.mxu1 %v5159_v63  ;;  %v5254_v62 = vld [vmem:[#allocation2 + $0x3cc] ss:$16 sps:$4 sm:$0xff]   ;;  %v5249_v63 = vld [vmem:[#allocation2 + $0x3c0] ss:$16 sps:$4 sm:$0xff]  }
  0x88   :  { %1520 = vmatpush1.bf16.msra.mxu0 %v5161_v0  ;;  %1684 = vmatpush1.bf16.msra.mxu1 %v5162_v1  ;;  %v5252_v0 = vld [vmem:[#allocation2 + $0x3c8] ss:$16 sps:$4 sm:$0xff]   ;;  %v5257_v1 = vld [vmem:[#allocation2 + $0x3e4] ss:$16 sps:$4 sm:$0xff]  }
  0x89   :  { %1530 = vmatprep.subr.bf16.mxu0 %v5167_v2  ;;  %1694 = vmatprep.subr.bf16.mxu1 %v5170_v3  ;;  %v5260_v2 = vld [vmem:[#allocation2 + $0x3ec] ss:$16 sps:$4 sm:$0xff]   ;;  %v5255_v3 = vld [vmem:[#allocation2 + $0x3e0] ss:$16 sps:$4 sm:$0xff]  }
  0x8b   :  { %1522 = vmatmul.mubr.bf16.vlgmr.msra.gmra.mrb[0].mxu0 %v4409_v4  ;;  %1686 = vmatmul.mubr.bf16.vlgmr.msra.gmra.mrb[0].mxu1 %v4409_v4  ;;  %v5258_v4 = vld [vmem:[#allocation2 + $0x3e8] ss:$16 sps:$4 sm:$0xff]  }
  0x8c   :  { %1531 = vmatpush1.bf16.msra.mxu0 %v5165_v5  ;;  %1695 = vmatpush1.bf16.msra.mxu1 %v5168_v6  ;;  %v5265_v5 = vld [vmem:[#allocation2 + $0x404] ss:$16 sps:$4 sm:$0xff]   ;;  %v5268_v6 = vld [vmem:[#allocation2 + $0x40c] ss:$16 sps:$4 sm:$0xff]  }
  0x8d   :  { %1532 = vmatprep.subr.bf16.mxu0 %v5173_v7  ;;  %1696 = vmatprep.subr.bf16.mxu1 %v5176_v8  ;;  %v4411_v7 = vcombine.low %v6107_v29, %v6107_v29  ;;  %v5263_v8 = vld [vmem:[#allocation2 + $0x400] ss:$16 sps:$4 sm:$0xff]   ;;  %v5298_v29 = vld [vmem:[#allocation2 + $0x4ac] ss:$16 sps:$4 sm:$0xff]  }
  0x8e   :  { %1562 = vmatprep.mubr.bf16.mxu0 %v4412_v30  ;;  %1726 = vmatprep.mubr.bf16.mxu1 %v4412_v30  ;;  %v5293_v30 = vld [vmem:[#allocation2 + $0x4a0] ss:$16 sps:$4 sm:$0xff]  }
  0x90   :  { %1533 = vmatpush1.bf16.msra.mxu0 %v5171_v9  ;;  %1697 = vmatpush1.bf16.msra.mxu1 %v5174_v10  ;;  %v5266_v9 = vld [vmem:[#allocation2 + $0x408] ss:$16 sps:$4 sm:$0xff]   ;;  %v5271_v10 = vld [vmem:[#allocation2 + $0x424] ss:$16 sps:$4 sm:$0xff]  }
  0x91   :  { %1534 = vmatprep.subr.bf16.mxu0 %v5179_v11  ;;  %1698 = vmatprep.subr.bf16.mxu1 %v5182_v12  ;;  %v6116_v11 = vld [vmem:[%s6244_s0 + $0x10] sm:$0xff]  ;;  %v5274_v12 = vld [vmem:[#allocation2 + $0x42c] ss:$16 sps:$4 sm:$0xff]  }
  0x94   :  { %1535 = vmatpush1.bf16.msra.mxu0 %v5177_v13  ;;  %1699 = vmatpush1.bf16.msra.mxu1 %v5180_v14  ;;  %v4414_v13 = vcombine.high %v6116_v11, %v6116_v11  ;;  %v5269_v14 = vld [vmem:[#allocation2 + $0x420] ss:$16 sps:$4 sm:$0xff]  }
  0x95   :  { %1536 = vmatprep.subr.bf16.mxu0 %v5185_v15  ;;  %1700 = vmatprep.subr.bf16.mxu1 %v5188_v16  ;;  %v5272_v15 = vld [vmem:[#allocation2 + $0x428] ss:$16 sps:$4 sm:$0xff]   ;;  %v5277_v16 = vld [vmem:[#allocation2 + $0x444] ss:$16 sps:$4 sm:$0xff]  }
  0x98   :  { %1537 = vmatpush1.bf16.msra.mxu0 %v5183_v17  ;;  %1701 = vmatpush1.bf16.msra.mxu1 %v5186_v18  ;;  %v5280_v17 = vld [vmem:[#allocation2 + $0x44c] ss:$16 sps:$4 sm:$0xff]   ;;  %v5275_v18 = vld [vmem:[#allocation2 + $0x440] ss:$16 sps:$4 sm:$0xff]  }
  0x99   :  { %1538 = vmatprep.subr.bf16.mxu0 %v5191_v19  ;;  %1702 = vmatprep.subr.bf16.mxu1 %v5194_v20  ;;  %v5278_v19 = vld [vmem:[#allocation2 + $0x448] ss:$16 sps:$4 sm:$0xff]   ;;  %v5283_v20 = vld [vmem:[#allocation2 + $0x464] ss:$16 sps:$4 sm:$0xff]  }
  0x9c   :  { %1539 = vmatpush1.bf16.msra.mxu0 %v5189_v21  ;;  %1703 = vmatpush1.bf16.msra.mxu1 %v5192_v22  ;;  %v5286_v21 = vld [vmem:[#allocation2 + $0x46c] ss:$16 sps:$4 sm:$0xff]   ;;  %v5281_v22 = vld [vmem:[#allocation2 + $0x460] ss:$16 sps:$4 sm:$0xff]  }
  0x9d   :  { %1540 = vmatprep.subr.bf16.mxu0 %v5197_v23  ;;  %1704 = vmatprep.subr.bf16.mxu1 %v5200_v24  ;;  %v5284_v23 = vld [vmem:[#allocation2 + $0x468] ss:$16 sps:$4 sm:$0xff]   ;;  %v5289_v24 = vld [vmem:[#allocation2 + $0x484] ss:$16 sps:$4 sm:$0xff]  }
  0xa0   :  { %1541 = vmatpush1.bf16.msra.mxu0 %v5195_v25  ;;  %1705 = vmatpush1.bf16.msra.mxu1 %v5198_v26  ;;  %v5292_v25 = vld [vmem:[#allocation2 + $0x48c] ss:$16 sps:$4 sm:$0xff]   ;;  %v5287_v26 = vld [vmem:[#allocation2 + $0x480] ss:$16 sps:$4 sm:$0xff]  }
  0xa1   :  { %1542 = vmatprep.subr.bf16.mxu0 %v5203_v27  ;;  %1706 = vmatprep.subr.bf16.mxu1 %v5206_v28  ;;  %v5290_v27 = vld [vmem:[#allocation2 + $0x488] ss:$16 sps:$4 sm:$0xff]   ;;  %v5295_v28 = vld [vmem:[#allocation2 + $0x4a4] ss:$16 sps:$4 sm:$0xff]  }
  0xa4   :  { %1543 = vmatpush1.bf16.msra.mxu0 %v5201_v31  ;;  %1707 = vmatpush1.bf16.msra.mxu1 %v5204_v32  ;;  %v5296_v31 = vld [vmem:[#allocation2 + $0x4a8] ss:$16 sps:$4 sm:$0xff]   ;;  %v5301_v32 = vld [vmem:[#allocation2 + $0x4c4] ss:$16 sps:$4 sm:$0xff]  }
  0xa5   :  { %1544 = vmatprep.subr.bf16.mxu0 %v5209_v33  ;;  %1708 = vmatprep.subr.bf16.mxu1 %v5212_v34  ;;  %v5304_v33 = vld [vmem:[#allocation2 + $0x4cc] ss:$16 sps:$4 sm:$0xff]   ;;  %v5299_v34 = vld [vmem:[#allocation2 + $0x4c0] ss:$16 sps:$4 sm:$0xff]  }
  0xa8   :  { %1545 = vmatpush1.bf16.msra.mxu0 %v5207_v35  ;;  %1709 = vmatpush1.bf16.msra.mxu1 %v5210_v36  ;;  %v5302_v35 = vld [vmem:[#allocation2 + $0x4c8] ss:$16 sps:$4 sm:$0xff]   ;;  %v5307_v36 = vld [vmem:[#allocation2 + $0x4e4] ss:$16 sps:$4 sm:$0xff]  }
  0xa9   :  { %1546 = vmatprep.subr.bf16.mxu0 %v5215_v37  ;;  %1710 = vmatprep.subr.bf16.mxu1 %v5218_v38  ;;  %v5310_v37 = vld [vmem:[#allocation2 + $0x4ec] ss:$16 sps:$4 sm:$0xff]   ;;  %v5305_v38 = vld [vmem:[#allocation2 + $0x4e0] ss:$16 sps:$4 sm:$0xff]  }
  0xac   :  { %1547 = vmatpush1.bf16.msra.mxu0 %v5213_v39  ;;  %1711 = vmatpush1.bf16.msra.mxu1 %v5216_v40  ;;  %v5308_v39 = vld [vmem:[#allocation2 + $0x4e8] ss:$16 sps:$4 sm:$0xff]   ;;  %v5313_v40 = vld [vmem:[#allocation2 + $0x504] ss:$16 sps:$4 sm:$0xff]  }
  0xad   :  { %1548 = vmatprep.subr.bf16.mxu0 %v5221_v41  ;;  %1712 = vmatprep.subr.bf16.mxu1 %v5224_v42  ;;  %v5316_v41 = vld [vmem:[#allocation2 + $0x50c] ss:$16 sps:$4 sm:$0xff]   ;;  %v5311_v42 = vld [vmem:[#allocation2 + $0x500] ss:$16 sps:$4 sm:$0xff]  }
  0xb0   :  { %1549 = vmatpush1.bf16.msra.mxu0 %v5219_v43  ;;  %1713 = vmatpush1.bf16.msra.mxu1 %v5222_v44  ;;  %v5314_v43 = vld [vmem:[#allocation2 + $0x508] ss:$16 sps:$4 sm:$0xff]   ;;  %v5319_v44 = vld [vmem:[#allocation2 + $0x524] ss:$16 sps:$4 sm:$0xff]  }
  0xb1   :  { %1550 = vmatprep.subr.bf16.mxu0 %v5227_v45  ;;  %1714 = vmatprep.subr.bf16.mxu1 %v5230_v46  ;;  %v5322_v45 = vld [vmem:[#allocation2 + $0x52c] ss:$16 sps:$4 sm:$0xff]   ;;  %v5317_v46 = vld [vmem:[#allocation2 + $0x520] ss:$16 sps:$4 sm:$0xff]  }
  0xb4   :  { %1551 = vmatpush1.bf16.msra.mxu0 %v5225_v47  ;;  %1715 = vmatpush1.bf16.msra.mxu1 %v5228_v48  ;;  %v5320_v47 = vld [vmem:[#allocation2 + $0x528] ss:$16 sps:$4 sm:$0xff]   ;;  %v5325_v48 = vld [vmem:[#allocation2 + $0x544] ss:$16 sps:$4 sm:$0xff]  }
  0xb5   :  { %1552 = vmatprep.subr.bf16.mxu0 %v5233_v49  ;;  %1716 = vmatprep.subr.bf16.mxu1 %v5236_v50  ;;  %v5328_v49 = vld [vmem:[#allocation2 + $0x54c] ss:$16 sps:$4 sm:$0xff]   ;;  %v5323_v50 = vld [vmem:[#allocation2 + $0x540] ss:$16 sps:$4 sm:$0xff]  }
  0xb8   :  { %1553 = vmatpush1.bf16.msra.mxu0 %v5231_v51  ;;  %1717 = vmatpush1.bf16.msra.mxu1 %v5234_v52  ;;  %v5326_v51 = vld [vmem:[#allocation2 + $0x548] ss:$16 sps:$4 sm:$0xff]   ;;  %v5331_v52 = vld [vmem:[#allocation2 + $0x564] ss:$16 sps:$4 sm:$0xff]  }
  0xb9   :  { %1554 = vmatprep.subr.bf16.mxu0 %v5239_v53  ;;  %1718 = vmatprep.subr.bf16.mxu1 %v5242_v54  ;;  %v5334_v53 = vld [vmem:[#allocation2 + $0x56c] ss:$16 sps:$4 sm:$0xff]   ;;  %v5329_v54 = vld [vmem:[#allocation2 + $0x560] ss:$16 sps:$4 sm:$0xff]  }
  0xbc   :  { %1555 = vmatpush1.bf16.msra.mxu0 %v5237_v55  ;;  %1719 = vmatpush1.bf16.msra.mxu1 %v5240_v56  ;;  %v5332_v55 = vld [vmem:[#allocation2 + $0x568] ss:$16 sps:$4 sm:$0xff]   ;;  %v5337_v56 = vld [vmem:[#allocation2 + $0x584] ss:$16 sps:$4 sm:$0xff]  }
  0xbd   :  { %1556 = vmatprep.subr.bf16.mxu0 %v5245_v57  ;;  %1720 = vmatprep.subr.bf16.mxu1 %v5248_v58  ;;  %v5340_v57 = vld [vmem:[#allocation2 + $0x58c] ss:$16 sps:$4 sm:$0xff]   ;;  %v5335_v58 = vld [vmem:[#allocation2 + $0x580] ss:$16 sps:$4 sm:$0xff]  }
  0xc0   :  { %1557 = vmatpush1.bf16.msra.mxu0 %v5243_v59  ;;  %1721 = vmatpush1.bf16.msra.mxu1 %v5246_v60  ;;  %v5338_v59 = vld [vmem:[#allocation2 + $0x588] ss:$16 sps:$4 sm:$0xff]   ;;  %v5343_v60 = vld [vmem:[#allocation2 + $0x5a4] ss:$16 sps:$4 sm:$0xff]  }
  0xc1   :  { %1558 = vmatprep.subr.bf16.mxu0 %v5251_v61  ;;  %1722 = vmatprep.subr.bf16.mxu1 %v5254_v62  ;;  %v5346_v61 = vld [vmem:[#allocation2 + $0x5ac] ss:$16 sps:$4 sm:$0xff]   ;;  %v5341_v62 = vld [vmem:[#allocation2 + $0x5a0] ss:$16 sps:$4 sm:$0xff]  }
  0xc4   :  { %1559 = vmatpush1.bf16.msra.mxu0 %v5249_v63  ;;  %1723 = vmatpush1.bf16.msra.mxu1 %v5252_v0  ;;  %v5344_v63 = vld [vmem:[#allocation2 + $0x5a8] ss:$16 sps:$4 sm:$0xff]   ;;  %v5349_v0 = vld [vmem:[#allocation2 + $0x5c4] ss:$16 sps:$4 sm:$0xff]  }
  0xc5   :  { %1560 = vmatprep.subr.bf16.mxu0 %v5257_v1  ;;  %1724 = vmatprep.subr.bf16.mxu1 %v5260_v2  ;;  %v5352_v1 = vld [vmem:[#allocation2 + $0x5cc] ss:$16 sps:$4 sm:$0xff]   ;;  %v5347_v2 = vld [vmem:[#allocation2 + $0x5c0] ss:$16 sps:$4 sm:$0xff]  }
  0xc8   :  { %1561 = vmatpush1.bf16.msra.mxu0 %v5255_v3  ;;  %1725 = vmatpush1.bf16.msra.mxu1 %v5258_v4  ;;  %v5350_v3 = vld [vmem:[#allocation2 + $0x5c8] ss:$16 sps:$4 sm:$0xff]   ;;  %v5355_v4 = vld [vmem:[#allocation2 + $0x5e4] ss:$16 sps:$4 sm:$0xff]  }
  0xc9   :  { %1571 = vmatprep.subr.bf16.mxu0 %v5265_v5  ;;  %1735 = vmatprep.subr.bf16.mxu1 %v5268_v6  ;;  %v5358_v5 = vld [vmem:[#allocation2 + $0x5ec] ss:$16 sps:$4 sm:$0xff]   ;;  %v5353_v6 = vld [vmem:[#allocation2 + $0x5e0] ss:$16 sps:$4 sm:$0xff]  }
  0xcb   :  { %1563 = vmatmul.mubr.bf16.vlgmr.msra.gmra.mrb[0].mxu0 %v4411_v7  ;;  %1727 = vmatmul.mubr.bf16.vlgmr.msra.gmra.mrb[0].mxu1 %v4411_v7  ;;  %v5356_v7 = vld [vmem:[#allocation2 + $0x5e8] ss:$16 sps:$4 sm:$0xff]  }
  0xcc   :  { %1572 = vmatpush1.bf16.msra.mxu0 %v5263_v8  ;;  %1736 = vmatpush1.bf16.msra.mxu1 %v5266_v9  ;;  %v5363_v8 = vld [vmem:[#allocation2 + $0x604] ss:$16 sps:$4 sm:$0xff]   ;;  %v5366_v9 = vld [vmem:[#allocation2 + $0x60c] ss:$16 sps:$4 sm:$0xff]  }
  0xcd   :  { %1573 = vmatprep.subr.bf16.mxu0 %v5271_v10  ;;  %1737 = vmatprep.subr.bf16.mxu1 %v5274_v12  ;;  %v5361_v10 = vld [vmem:[#allocation2 + $0x600] ss:$16 sps:$4 sm:$0xff]   ;;  %v5364_v12 = vld [vmem:[#allocation2 + $0x608] ss:$16 sps:$4 sm:$0xff]  }
  0xce   :  { %1603 = vmatprep.mubr.bf16.mxu0 %v4414_v13  ;;  %1767 = vmatprep.mubr.bf16.mxu1 %v4414_v13  ;;  %v4413_v13 = vcombine.low %v6116_v11, %v6116_v11  ;;  %v5381_v11 = vld [vmem:[#allocation2 + $0x664] ss:$16 sps:$4 sm:$0xff]  }
  0xd0   :  { %1574 = vmatpush1.bf16.msra.mxu0 %v5269_v14  ;;  %1738 = vmatpush1.bf16.msra.mxu1 %v5272_v15  ;;  %v5369_v14 = vld [vmem:[#allocation2 + $0x624] ss:$16 sps:$4 sm:$0xff]   ;;  %v5372_v15 = vld [vmem:[#allocation2 + $0x62c] ss:$16 sps:$4 sm:$0xff]  }
  0xd1   :  { %1575 = vmatprep.subr.bf16.mxu0 %v5277_v16  ;;  %1739 = vmatprep.subr.bf16.mxu1 %v5280_v17  ;;  %v5367_v16 = vld [vmem:[#allocation2 + $0x620] ss:$16 sps:$4 sm:$0xff]   ;;  %v5370_v17 = vld [vmem:[#allocation2 + $0x628] ss:$16 sps:$4 sm:$0xff]  }
  0xd4   :  { %1576 = vmatpush1.bf16.msra.mxu0 %v5275_v18  ;;  %1740 = vmatpush1.bf16.msra.mxu1 %v5278_v19  ;;  %v5375_v18 = vld [vmem:[#allocation2 + $0x644] ss:$16 sps:$4 sm:$0xff]   ;;  %v5378_v19 = vld [vmem:[#allocation2 + $0x64c] ss:$16 sps:$4 sm:$0xff]  }
  0xd5   :  { %1577 = vmatprep.subr.bf16.mxu0 %v5283_v20  ;;  %1741 = vmatprep.subr.bf16.mxu1 %v5286_v21  ;;  %v5373_v20 = vld [vmem:[#allocation2 + $0x640] ss:$16 sps:$4 sm:$0xff]   ;;  %v5376_v21 = vld [vmem:[#allocation2 + $0x648] ss:$16 sps:$4 sm:$0xff]  }
  0xd8   :  { %1578 = vmatpush1.bf16.msra.mxu0 %v5281_v22  ;;  %1742 = vmatpush1.bf16.msra.mxu1 %v5284_v23  ;;  %v5980_v22 = vmov 0   ;;  %v5384_v23 = vld [vmem:[#allocation2 + $0x66c] ss:$16 sps:$4 sm:$0xff]  }
  0xd9   :  { %1579 = vmatprep.subr.bf16.mxu0 %v5289_v24  ;;  %1743 = vmatprep.subr.bf16.mxu1 %v5292_v25  ;;  %v5379_v24 = vld [vmem:[#allocation2 + $0x660] ss:$16 sps:$4 sm:$0xff]   ;;  %v5382_v25 = vld [vmem:[#allocation2 + $0x668] ss:$16 sps:$4 sm:$0xff]  }
  0xdc   :  { %1580 = vmatpush1.bf16.msra.mxu0 %v5287_v26  ;;  %1744 = vmatpush1.bf16.msra.mxu1 %v5290_v27  ;;  %v5387_v26 = vld [vmem:[#allocation2 + $0x684] ss:$16 sps:$4 sm:$0xff]   ;;  %v5390_v27 = vld [vmem:[#allocation2 + $0x68c] ss:$16 sps:$4 sm:$0xff]  }
  0xdd   :  { %1581 = vmatprep.subr.bf16.mxu0 %v5295_v28  ;;  %1745 = vmatprep.subr.bf16.mxu1 %v5298_v29  ;;  %v5385_v28 = vld [vmem:[#allocation2 + $0x680] ss:$16 sps:$4 sm:$0xff]   ;;  %v5388_v29 = vld [vmem:[#allocation2 + $0x688] ss:$16 sps:$4 sm:$0xff]  }
  0xe0   :  { %1582 = vmatpush1.bf16.msra.mxu0 %v5293_v30  ;;  %1746 = vmatpush1.bf16.msra.mxu1 %v5296_v31  ;;  %v5393_v30 = vld [vmem:[#allocation2 + $0x6a4] ss:$16 sps:$4 sm:$0xff]   ;;  %v5396_v31 = vld [vmem:[#allocation2 + $0x6ac] ss:$16 sps:$4 sm:$0xff]  }
  0xe1   :  { %1583 = vmatprep.subr.bf16.mxu0 %v5301_v32  ;;  %1747 = vmatprep.subr.bf16.mxu1 %v5304_v33  ;;  %v5391_v32 = vld [vmem:[#allocation2 + $0x6a0] ss:$16 sps:$4 sm:$0xff]   ;;  %v5394_v33 = vld [vmem:[#allocation2 + $0x6a8] ss:$16 sps:$4 sm:$0xff]  }
  0xe4   :  { %1584 = vmatpush1.bf16.msra.mxu0 %v5299_v34  ;;  %1748 = vmatpush1.bf16.msra.mxu1 %v5302_v35  ;;  %v5399_v34 = vld [vmem:[#allocation2 + $0x6c4] ss:$16 sps:$4 sm:$0xff]   ;;  %v5402_v35 = vld [vmem:[#allocation2 + $0x6cc] ss:$16 sps:$4 sm:$0xff]  }
  0xe5   :  { %1585 = vmatprep.subr.bf16.mxu0 %v5307_v36  ;;  %1749 = vmatprep.subr.bf16.mxu1 %v5310_v37  ;;  %v5397_v36 = vld [vmem:[#allocation2 + $0x6c0] ss:$16 sps:$4 sm:$0xff]   ;;  %v5400_v37 = vld [vmem:[#allocation2 + $0x6c8] ss:$16 sps:$4 sm:$0xff]  }
  0xe8   :  { %1586 = vmatpush1.bf16.msra.mxu0 %v5305_v38  ;;  %1750 = vmatpush1.bf16.msra.mxu1 %v5308_v39  ;;  %v5405_v38 = vld [vmem:[#allocation2 + $0x6e4] ss:$16 sps:$4 sm:$0xff]   ;;  %v5408_v39 = vld [vmem:[#allocation2 + $0x6ec] ss:$16 sps:$4 sm:$0xff]  }
  0xe9   :  { %1587 = vmatprep.subr.bf16.mxu0 %v5313_v40  ;;  %1751 = vmatprep.subr.bf16.mxu1 %v5316_v41  ;;  %v5403_v40 = vld [vmem:[#allocation2 + $0x6e0] ss:$16 sps:$4 sm:$0xff]   ;;  %v5406_v41 = vld [vmem:[#allocation2 + $0x6e8] ss:$16 sps:$4 sm:$0xff]  }
  0xec   :  { %1588 = vmatpush1.bf16.msra.mxu0 %v5311_v42  ;;  %1752 = vmatpush1.bf16.msra.mxu1 %v5314_v43  ;;  %v5412_v42 = vld [vmem:[#allocation4 + $0x4] ss:$8 sps:$4 sm:$0xff]   ;;  %v5409_v43 = vld [vmem:[%s6244_s0 + $0x18] ss:$0 sps:$4 sm:$0xff]  }
  0xed   :  { %1589 = vmatprep.subr.bf16.mxu0 %v5319_v44  ;;  %1753 = vmatprep.subr.bf16.mxu1 %v5322_v45  ;;  %v5410_v44 = vld [vmem:[#allocation4] ss:$8 sps:$4 sm:$0xff]   ;;  %v5415_v45 = vld [vmem:[#allocation4 + $0x14] ss:$8 sps:$4 sm:$0xff]  }
  0xf0   :  { %1590 = vmatpush1.bf16.msra.mxu0 %v5317_v46  ;;  %1754 = vmatpush1.bf16.msra.mxu1 %v5320_v47  ;;  %v5413_v46 = vld [vmem:[#allocation4 + $0x10] ss:$8 sps:$4 sm:$0xff]   ;;  %v5418_v47 = vld [vmem:[#allocation4 + $0x24] ss:$8 sps:$4 sm:$0xff]  }
  0xf1   :  { %1591 = vmatprep.subr.bf16.mxu0 %v5325_v48  ;;  %1755 = vmatprep.subr.bf16.mxu1 %v5328_v49  ;;  %v5416_v48 = vld [vmem:[#allocation4 + $0x20] ss:$8 sps:$4 sm:$0xff]   ;;  %v5421_v49 = vld [vmem:[#allocation4 + $0x34] ss:$8 sps:$4 sm:$0xff]  }
  0xf4   :  { %1592 = vmatpush1.bf16.msra.mxu0 %v5323_v50  ;;  %1756 = vmatpush1.bf16.msra.mxu1 %v5326_v51  ;;  %v5419_v50 = vld [vmem:[#allocation4 + $0x30] ss:$8 sps:$4 sm:$0xff]   ;;  %v5424_v51 = vld [vmem:[#allocation4 + $0x44] ss:$8 sps:$4 sm:$0xff]  }
  0xf5   :  { %1593 = vmatprep.subr.bf16.mxu0 %v5331_v52  ;;  %1757 = vmatprep.subr.bf16.mxu1 %v5334_v53  ;;  %v5422_v52 = vld [vmem:[#allocation4 + $0x40] ss:$8 sps:$4 sm:$0xff]   ;;  %v5427_v53 = vld [vmem:[#allocation4 + $0x54] ss:$8 sps:$4 sm:$0xff]  }
  0xf8   :  { %1594 = vmatpush1.bf16.msra.mxu0 %v5329_v54  ;;  %1758 = vmatpush1.bf16.msra.mxu1 %v5332_v55  ;;  %v5425_v54 = vld [vmem:[#allocation4 + $0x50] ss:$8 sps:$4 sm:$0xff]   ;;  %v5430_v55 = vld [vmem:[#allocation4 + $0x64] ss:$8 sps:$4 sm:$0xff]  }
  0xf9   :  { %1595 = vmatprep.subr.bf16.mxu0 %v5337_v56  ;;  %1759 = vmatprep.subr.bf16.mxu1 %v5340_v57  ;;  %v5428_v56 = vld [vmem:[#allocation4 + $0x60] ss:$8 sps:$4 sm:$0xff]   ;;  %v5433_v57 = vld [vmem:[#allocation4 + $0x74] ss:$8 sps:$4 sm:$0xff]  }
  0xfc   :  { %1596 = vmatpush1.bf16.msra.mxu0 %v5335_v58  ;;  %1760 = vmatpush1.bf16.msra.mxu1 %v5338_v59  ;;  %v5431_v58 = vld [vmem:[#allocation4 + $0x70] ss:$8 sps:$4 sm:$0xff]   ;;  %v5436_v59 = vld [vmem:[#allocation4 + $0x84] ss:$8 sps:$4 sm:$0xff]  }
  0xfd   :  { %1597 = vmatprep.subr.bf16.mxu0 %v5343_v60  ;;  %1761 = vmatprep.subr.bf16.mxu1 %v5346_v61  ;;  %v5434_v60 = vld [vmem:[#allocation4 + $0x80] ss:$8 sps:$4 sm:$0xff]   ;;  %v5439_v61 = vld [vmem:[#allocation4 + $0x94] ss:$8 sps:$4 sm:$0xff]  }
 0x100   :  { %1598 = vmatpush1.bf16.msra.mxu0 %v5341_v62  ;;  %1762 = vmatpush1.bf16.msra.mxu1 %v5344_v63  ;;  %v5437_v62 = vld [vmem:[#allocation4 + $0x90] ss:$8 sps:$4 sm:$0xff]   ;;  %v5442_v63 = vld [vmem:[#allocation4 + $0xa4] ss:$8 sps:$4 sm:$0xff]  }
 0x101   :  { %1599 = vmatprep.subr.bf16.mxu0 %v5349_v0  ;;  %1763 = vmatprep.subr.bf16.mxu1 %v5352_v1  ;;  %v5440_v0 = vld [vmem:[#allocation4 + $0xa0] ss:$8 sps:$4 sm:$0xff]   ;;  %v5445_v1 = vld [vmem:[#allocation4 + $0xb4] ss:$8 sps:$4 sm:$0xff]  }
 0x104   :  { %1600 = vmatpush1.bf16.msra.mxu0 %v5347_v2  ;;  %1764 = vmatpush1.bf16.msra.mxu1 %v5350_v3  ;;  %v5443_v2 = vld [vmem:[#allocation4 + $0xb0] ss:$8 sps:$4 sm:$0xff]   ;;  %v5448_v3 = vld [vmem:[#allocation4 + $0xc4] ss:$8 sps:$4 sm:$0xff]  }
 0x105   :  { %1601 = vmatprep.subr.bf16.mxu0 %v5355_v4  ;;  %1765 = vmatprep.subr.bf16.mxu1 %v5358_v5  ;;  %v5446_v4 = vld [vmem:[#allocation4 + $0xc0] ss:$8 sps:$4 sm:$0xff]   ;;  %v5451_v5 = vld [vmem:[#allocation4 + $0xd4] ss:$8 sps:$4 sm:$0xff]  }
 0x108   :  { %1602 = vmatpush1.bf16.msra.mxu0 %v5353_v6  ;;  %1766 = vmatpush1.bf16.msra.mxu1 %v5356_v7  ;;  %v5449_v6 = vld [vmem:[#allocation4 + $0xd0] ss:$8 sps:$4 sm:$0xff]   ;;  %v5454_v7 = vld [vmem:[#allocation4 + $0xe4] ss:$8 sps:$4 sm:$0xff]  }
 0x109   :  { %1612 = vmatprep.subr.bf16.mxu0 %v5363_v8  ;;  %1776 = vmatprep.subr.bf16.mxu1 %v5366_v9  ;;  %v5452_v8 = vld [vmem:[#allocation4 + $0xe0] ss:$8 sps:$4 sm:$0xff]   ;;  %v5457_v9 = vld [vmem:[#allocation4 + $0xf4] ss:$8 sps:$4 sm:$0xff]  }
 0x10b   :  { %1604 = vmatmul.mubr.bf16.vlgmr.msra.gmra.mrb[0].mxu0 %v4413_v13  ;;  %1768 = vmatmul.mubr.bf16.vlgmr.msra.gmra.mrb[0].mxu1 %v4413_v13  ;;  %v5506_v13 = vld [vmem:[#allocation6] ss:$16 sps:$4 sm:$0xff]  }
 0x10c   :  { %1613 = vmatpush1.bf16.msra.mxu0 %v5361_v10  ;;  %1777 = vmatpush1.bf16.msra.mxu1 %v5364_v12  ;;  %v5455_v10 = vld [vmem:[#allocation4 + $0xf0] ss:$8 sps:$4 sm:$0xff]   ;;  %v5460_v12 = vld [vmem:[#allocation4 + $0x104] ss:$8 sps:$4 sm:$0xff]  }
 0x10d   :  { %1614 = vmatprep.subr.bf16.mxu0 %v5369_v14  ;;  %1778 = vmatprep.subr.bf16.mxu1 %v5372_v15  ;;  %v5508_v14 = vld [vmem:[#allocation6 + $0x4] ss:$16 sps:$4 sm:$0xff]  }
 0x10e   :  { %1644 = vmatprep.mubr.bf16.mxu0 %v5980_v22  ;;  %1808 = vmatprep.mubr.bf16.mxu1 %v5980_v22  ;;  %v5511_v15 = vld [vmem:[#allocation6 + $0x24] ss:$16 sps:$4 sm:$0xff]  }
 0x110   :  { %1615 = vmatpush1.bf16.msra.mxu0 %v5367_v16  ;;  %1779 = vmatpush1.bf16.msra.mxu1 %v5370_v17  ;;  %v5509_v16 = vld [vmem:[#allocation6 + $0x20] ss:$16 sps:$4 sm:$0xff]   ;;  %v324_v17 = vlaneseq }
 0x111   :  { %1616 = vmatprep.subr.bf16.mxu0 %v5375_v18  ;;  %1780 = vmatprep.subr.bf16.mxu1 %v5378_v19 }
 0x112   :  { %v6128_v18 = vshrl.u32 %v324_v17, 7  ;;  %v5512_v17 = vld [vmem:[#allocation6 + $0x40] ss:$16 sps:$4 sm:$0xff]  }
 0x114   :  { %1617 = vmatpush1.bf16.msra.mxu0 %v5373_v20  ;;  %1781 = vmatpush1.bf16.msra.mxu1 %v5376_v21  ;;  %v6131_v19 = vsub.s32 0, %v6128_v18  ;;  %v6136_v20 = vld [vmem:[%s6247_s3] sm:$0xf]  ;;  %v6139_v21 = vsub.s32 1, %v6128_v18 }
 0x115   :  { %1618 = vmatprep.subr.bf16.mxu0 %v5381_v11  ;;  %1782 = vmatprep.subr.bf16.mxu1 %v5384_v23  ;;  %v6142_v11 = vsub.s32 3, %v6128_v18 }
 0x116   :  { %v327_v23 = vrot.slane %v6136_v20, %v6131_v19 }
 0x118   :  { %1619 = vmatpush1.bf16.msra.mxu0 %v5379_v24  ;;  %1783 = vmatpush1.bf16.msra.mxu1 %v5382_v25  ;;  %v331_v24 = vrot.slane %v6136_v20, %v6139_v21  ;;  %v339_v25 = vrot.slane %v6136_v20, %v6142_v11 }
 0x119   :  { %1620 = vmatprep.subr.bf16.mxu0 %v5387_v26  ;;  %1784 = vmatprep.subr.bf16.mxu1 %v5390_v27 }
 0x11c   :  { %1621 = vmatpush1.bf16.msra.mxu0 %v5385_v28  ;;  %1785 = vmatpush1.bf16.msra.mxu1 %v5388_v29 }
 0x11d   :  { %1622 = vmatprep.subr.bf16.mxu0 %v5393_v30  ;;  %1786 = vmatprep.subr.bf16.mxu1 %v5396_v31 }
 0x120   :  { %1623 = vmatpush1.bf16.msra.mxu0 %v5391_v32  ;;  %1787 = vmatpush1.bf16.msra.mxu1 %v5394_v33 }
 0x121   :  { %1624 = vmatprep.subr.bf16.mxu0 %v5399_v34  ;;  %1788 = vmatprep.subr.bf16.mxu1 %v5402_v35 }
 0x124   :  { %1625 = vmatpush1.bf16.msra.mxu0 %v5397_v36  ;;  %1789 = vmatpush1.bf16.msra.mxu1 %v5400_v37 }
 0x125   :  { %1626 = vmatprep.subr.bf16.mxu0 %v5405_v38  ;;  %1790 = vmatprep.subr.bf16.mxu1 %v5408_v39 }
 0x128   :  { %1627 = vmatpush1.bf16.msra.mxu0 %v5403_v40  ;;  %1791 = vmatpush1.bf16.msra.mxu1 %v5406_v41  ;;  %v5458_v41 = vld [vmem:[#allocation4 + $0x100] ss:$8 sps:$4 sm:$0xff]  }
 0x129   :  { %2221 = vmatprep.subr.bf16.mxu0 %v5412_v42  ;;  %2526 = vmatprep.subr.bf16.mxu1 %v5508_v14 }
 0x12b   :  { %1645 = vmatmul.mubr.bf16.vlgmr.msra.gmra.mrb[0].mxu0 %v5409_v43  ;;  %1809 = vmatmul.mubr.bf16.vlgmr.msra.gmra.mrb[0].mxu1 %v5409_v43  ;;  %v5463_v43 = vld [vmem:[#allocation4 + $0x114] ss:$8 sps:$4 sm:$0xff]  }
 0x12c   :  { %2222 = vmatpush1.bf16.msra.mxu0 %v5410_v44  ;;  %2558 = vmatprep.mubr.bf16.mxu1 %v5980_v22 }
 0x12d   :  { %2223 = vmatprep.subr.bf16.mxu0 %v5415_v45  ;;  %2527 = vmatpush1.bf16.msra.mxu1 %v5506_v13  ;;  %v5461_v45 = vld [vmem:[#allocation4 + $0x110] ss:$8 sps:$4 sm:$0xff]  }
 0x12e   :  { %2528 = vmatprep.subr.bf16.mxu1 %v5511_v15  ;;  %v5503_v13 = vld [vmem:[#allocation4 + $0x1f0] ss:$8 sps:$4 sm:$0xff]  }
 0x130   :  { %2224 = vmatpush1.bf16.msra.mxu0 %v5413_v46  ;;  %v5466_v46 = vld [vmem:[#allocation4 + $0x124] ss:$8 sps:$4 sm:$0xff]  }
 0x131   :  { %2225 = vmatprep.subr.bf16.mxu0 %v5418_v47  ;;  %2529 = vmatpush1.bf16.msra.mxu1 %v5509_v16  ;;  %v5464_v47 = vld [vmem:[#allocation4 + $0x120] ss:$8 sps:$4 sm:$0xff]   ;;  %v5514_v16 = vld [vmem:[#allocation6 + $0x44] ss:$16 sps:$4 sm:$0xff]  }
 0x132   :  { %2530 = vmatprep.subr.bf16.mxu1 %v5514_v16  ;;  %v5535_v16 = vld [vmem:[#allocation6 + $0x2c] ss:$16 sps:$4 sm:$0xff]  }
 0x134   :  { %2226 = vmatpush1.bf16.msra.mxu0 %v5416_v48  ;;  %v5469_v48 = vld [vmem:[#allocation4 + $0x134] ss:$8 sps:$4 sm:$0xff]  }
 0x135   :  { %2227 = vmatprep.subr.bf16.mxu0 %v5421_v49  ;;  %v5467_v49 = vld [vmem:[#allocation4 + $0x130] ss:$8 sps:$4 sm:$0xff]   ;;  %2531 = vmatpush1.bf16.msra.mxu1 %v5512_v17 }
 0x136   :  { %v5533_v17 = vld [vmem:[#allocation6 + $0x28] ss:$16 sps:$4 sm:$0xff]  }
 0x138   :  { %2228 = vmatpush1.bf16.msra.mxu0 %v5419_v50  ;;  %v5472_v50 = vld [vmem:[#allocation4 + $0x144] ss:$8 sps:$4 sm:$0xff]  }
 0x139   :  { %2229 = vmatprep.subr.bf16.mxu0 %v5424_v51  ;;  %v5470_v51 = vld [vmem:[#allocation4 + $0x140] ss:$8 sps:$4 sm:$0xff]  }
 0x13c   :  { %2230 = vmatpush1.bf16.msra.mxu0 %v5422_v52  ;;  %v5475_v52 = vld [vmem:[#allocation4 + $0x154] ss:$8 sps:$4 sm:$0xff]  }
 0x13d   :  { %2231 = vmatprep.subr.bf16.mxu0 %v5427_v53  ;;  %v5473_v53 = vld [vmem:[#allocation4 + $0x150] ss:$8 sps:$4 sm:$0xff]  }
 0x140   :  { %2232 = vmatpush1.bf16.msra.mxu0 %v5425_v54  ;;  %v5478_v54 = vld [vmem:[#allocation4 + $0x164] ss:$8 sps:$4 sm:$0xff]  }
 0x141   :  { %2233 = vmatprep.subr.bf16.mxu0 %v5430_v55  ;;  %v5476_v55 = vld [vmem:[#allocation4 + $0x160] ss:$8 sps:$4 sm:$0xff]  }
 0x144   :  { %2234 = vmatpush1.bf16.msra.mxu0 %v5428_v56  ;;  %v5481_v56 = vld [vmem:[#allocation4 + $0x174] ss:$8 sps:$4 sm:$0xff]  }
 0x145   :  { %2235 = vmatprep.subr.bf16.mxu0 %v5433_v57  ;;  %v5479_v57 = vld [vmem:[#allocation4 + $0x170] ss:$8 sps:$4 sm:$0xff]  }
 0x148   :  { %2236 = vmatpush1.bf16.msra.mxu0 %v5431_v58  ;;  %v5484_v58 = vld [vmem:[#allocation4 + $0x184] ss:$8 sps:$4 sm:$0xff]  }
 0x149   :  { %2237 = vmatprep.subr.bf16.mxu0 %v5436_v59  ;;  %v5482_v59 = vld [vmem:[#allocation4 + $0x180] ss:$8 sps:$4 sm:$0xff]  }
 0x14c   :  { %2238 = vmatpush1.bf16.msra.mxu0 %v5434_v60  ;;  %v5487_v60 = vld [vmem:[#allocation4 + $0x194] ss:$8 sps:$4 sm:$0xff]  }
 0x14d   :  { %2239 = vmatprep.subr.bf16.mxu0 %v5439_v61  ;;  %v5485_v61 = vld [vmem:[#allocation4 + $0x190] ss:$8 sps:$4 sm:$0xff]  }
 0x150   :  { %2240 = vmatpush1.bf16.msra.mxu0 %v5437_v62  ;;  %v5490_v62 = vld [vmem:[#allocation4 + $0x1a4] ss:$8 sps:$4 sm:$0xff]  }
 0x151   :  { %2241 = vmatprep.subr.bf16.mxu0 %v5442_v63  ;;  %v5488_v63 = vld [vmem:[#allocation4 + $0x1a0] ss:$8 sps:$4 sm:$0xff]  }
 0x154   :  { %2242 = vmatpush1.bf16.msra.mxu0 %v5440_v0  ;;  %v5493_v0 = vld [vmem:[#allocation4 + $0x1b4] ss:$8 sps:$4 sm:$0xff]  }
 0x155   :  { %2243 = vmatprep.subr.bf16.mxu0 %v5445_v1  ;;  %v5491_v1 = vld [vmem:[#allocation4 + $0x1b0] ss:$8 sps:$4 sm:$0xff]  }
 0x158   :  { %2244 = vmatpush1.bf16.msra.mxu0 %v5443_v2  ;;  %v5496_v2 = vld [vmem:[#allocation4 + $0x1c4] ss:$8 sps:$4 sm:$0xff]  }
 0x159   :  { %2245 = vmatprep.subr.bf16.mxu0 %v5448_v3  ;;  %v5494_v3 = vld [vmem:[#allocation4 + $0x1c0] ss:$8 sps:$4 sm:$0xff]  }
 0x15c   :  { %2246 = vmatpush1.bf16.msra.mxu0 %v5446_v4  ;;  %v6153_v4 = vsub.s32 2, %v6128_v18 }
 0x15d   :  { %2247 = vmatprep.subr.bf16.mxu0 %v5451_v5  ;;  %v5499_v5 = vld [vmem:[#allocation4 + $0x1d4] ss:$8 sps:$4 sm:$0xff]  }
 0x160   :  { %2248 = vmatpush1.bf16.msra.mxu0 %v5449_v6  ;;  %v5497_v6 = vld [vmem:[#allocation4 + $0x1d0] ss:$8 sps:$4 sm:$0xff]  }
 0x161   :  { %2249 = vmatprep.subr.bf16.mxu0 %v5454_v7  ;;  %v335_v7 = vrot.slane %v6136_v20, %v6153_v4  ;;  %v5517_v20 = vld [vmem:[#allocation6 + $0x64] ss:$16 sps:$4 sm:$0xff]  }
 0x162   :  { %2532 = vmatprep.subr.bf16.mxu1 %v5517_v20  ;;  %v5538_v20 = vld [vmem:[#allocation6 + $0x4c] ss:$16 sps:$4 sm:$0xff]  }
 0x164   :  { %2250 = vmatpush1.bf16.msra.mxu0 %v5452_v8  ;;  %v5502_v8 = vld [vmem:[#allocation4 + $0x1e4] ss:$8 sps:$4 sm:$0xff]  }
 0x165   :  { %2251 = vmatprep.subr.bf16.mxu0 %v5457_v9  ;;  %v5500_v9 = vld [vmem:[#allocation4 + $0x1e0] ss:$8 sps:$4 sm:$0xff]  }
 0x168   :  { %2252 = vmatpush1.bf16.msra.mxu0 %v5455_v10 }
 0x169   :  { %2262 = vmatprep.subr.bf16.mxu0 %v5460_v12  ;;  %v5505_v12 = vld [vmem:[#allocation4 + $0x1f4] ss:$8 sps:$4 sm:$0xff]  }
 0x1fe   :  { %v1646_v26 = vpop.f32.mrb[0].mxu0  ;;  %v6150_v27 = vpop.f32.mrb[0].mxu1 }
 0x1ff   :  { %v5004_v28 = vadd.f32 %v1646_v26, %v327_v23  ;;  %v1648_v29 = vpop.f32.mrb[1].mxu0  ;;  %v1812_v30 = vpop.f32.mrb[1].mxu1  ;;  %v5006_v10 = vadd.f32 %v6150_v27, %v335_v7  ;;  %v5515_v23 = vld [vmem:[#allocation6 + $0x60] ss:$16 sps:$4 sm:$0xff]   ;;  %v5523_v26 = vld [vmem:[#allocation6 + $0xa4] ss:$16 sps:$4 sm:$0xff]  }
 0x200   :  { %v5005_v31 = vadd.f32 %v1648_v29, %v331_v24  ;;  %v5007_v32 = vadd.f32 %v1812_v30, %v339_v25  ;;  %v1650_v33 = vpop.f32.mrb[2].mxu0  ;;  %v1814_v34 = vpop.f32.mrb[2].mxu1  ;;  %2533 = vmatpush1.bf16.msra.mxu1 %v5515_v23  ;;  %v5520_v24 = vld [vmem:[#allocation6 + $0x84] ss:$16 sps:$4 sm:$0xff]   ;;  %v5518_v25 = vld [vmem:[#allocation6 + $0x80] ss:$16 sps:$4 sm:$0xff]  }
 0x201   :  { %v1817_v35 = vmax.f32 %v5004_v28, 0.0  ;;  %v1651_v36 = vpop.f32.mrb[3].mxu0  ;;  %v1815_v37 = vpop.f32.mrb[3].mxu1  ;;  %v1819_v14 = vmax.f32 %v5006_v10, 0.0  ;;  %2534 = vmatprep.subr.bf16.mxu1 %v5520_v24  ;;  %v5521_v27 = vld [vmem:[#allocation6 + $0xa0] ss:$16 sps:$4 sm:$0xff]  }
 0x202   :  { %v1818_v38 = vmax.f32 %v5005_v31, 0.0  ;;  %v1820_v39 = vmax.f32 %v5007_v32, 0.0  ;;  %v5526_v28 = vld [vmem:[#allocation6 + $0xc4] ss:$16 sps:$4 sm:$0xff]   ;;  %v5524_v29 = vld [vmem:[#allocation6 + $0xc0] ss:$16 sps:$4 sm:$0xff]  }
 0x203   :  { %v1821_v42 = vpack.c.bf16 %v1817_v35, %v1817_v35  ;;  %v1823_v15 = vpack.c.bf16 %v1819_v14, %v1819_v14  ;;  %v5529_v30 = vld [vmem:[#allocation6 + $0xe4] ss:$16 sps:$4 sm:$0xff]   ;;  %v5527_v31 = vld [vmem:[#allocation6 + $0xe0] ss:$16 sps:$4 sm:$0xff]   ;;  %v5532_v32 = vld [vmem:[#allocation6 + $0xc] ss:$16 sps:$4 sm:$0xff]  }
 0x204   :  { %v1822_v40 = vpack.c.bf16 %v1818_v38, %v1818_v38  ;;  %v1824_v44 = vpack.c.bf16 %v1820_v39, %v1820_v39  ;;  %2535 = vmatpush1.bf16.msra.mxu1 %v5518_v25  ;;  %v5557_v33 = vld [vmem:[#allocation7 + $0x8] ss:$28 sps:$4 sm:$0xff]   ;;  %v5563_v36 = vld [vmem:[#allocation7 + $0x40] ss:$28 sps:$4 sm:$0xff]   ;;  %v5569_v38 = vld [vmem:[#allocation7 + $0x78] ss:$28 sps:$4 sm:$0xff]  }
 0x205   :  { %2536 = vmatprep.subr.bf16.mxu1 %v5523_v26  ;;  %v5559_v34 = vld [vmem:[#allocation7 + $0xc] ss:$28 sps:$4 sm:$0xff]   ;;  %v5565_v35 = vld [vmem:[#allocation7 + $0x44] ss:$28 sps:$4 sm:$0xff]   ;;  %v5571_v37 = vld [vmem:[#allocation7 + $0x7c] ss:$28 sps:$4 sm:$0xff]  }
 0x206   :  { %2253 = vmatprep.mubr.bf16.mxu0 %v1822_v40  ;;  %v5577_v39 = vld [vmem:[#allocation7 + $0xb4] ss:$28 sps:$4 sm:$0xff]   ;;  %v5530_v14 = vld [vmem:[#allocation6 + $0x8] ss:$16 sps:$4 sm:$0xff]   ;;  %v5541_v24 = vld [vmem:[#allocation6 + $0x6c] ss:$16 sps:$4 sm:$0xff]  }
 0x207   :  { %2254 = vmatmul.mubr.bf16.vlgmr.msra.gmra.mrb[4].mxu0 %v1821_v42  ;;  %v5575_v40 = vld [vmem:[#allocation7 + $0xb0] ss:$28 sps:$4 sm:$0xff]   ;;  %v5581_v42 = vld [vmem:[#allocation7 + $0xe8] ss:$28 sps:$4 sm:$0xff]  }
 0x208   :  { %2263 = vmatpush1.bf16.msra.mxu0 %v5458_v41  ;;  %2294 = vmatprep.mubr.bf16.mxu0 %v1824_v44  ;;  %v5583_v41 = vld [vmem:[#allocation7 + $0xec] ss:$28 sps:$4 sm:$0xff]   ;;  %v5587_v44 = vld [vmem:[#allocation7 + $0x120] ss:$28 sps:$4 sm:$0xff]  }
 0x209   :  { %2264 = vmatprep.subr.bf16.mxu0 %v5463_v43  ;;  %2537 = vmatpush1.bf16.msra.mxu1 %v5521_v27  ;;  %v5589_v43 = vld [vmem:[#allocation7 + $0x124] ss:$28 sps:$4 sm:$0xff]   ;;  %v5536_v23 = vld [vmem:[#allocation6 + $0x48] ss:$16 sps:$4 sm:$0xff]   ;;  %v5544_v26 = vld [vmem:[#allocation6 + $0x8c] ss:$16 sps:$4 sm:$0xff]  }
 0x20a   :  { %2538 = vmatprep.subr.bf16.mxu1 %v5526_v28  ;;  %v5539_v25 = vld [vmem:[#allocation6 + $0x68] ss:$16 sps:$4 sm:$0xff]   ;;  %v5547_v28 = vld [vmem:[#allocation6 + $0xac] ss:$16 sps:$4 sm:$0xff]  }
 0x20b   :  { %v5542_v27 = vld [vmem:[#allocation6 + $0x88] ss:$16 sps:$4 sm:$0xff]  }
 0x20c   :  { %2265 = vmatpush1.bf16.msra.mxu0 %v5461_v45  ;;  %v5595_v45 = vld [vmem:[#allocation7 + $0x15c] ss:$28 sps:$4 sm:$0xff]  }
 0x20d   :  { %2266 = vmatprep.subr.bf16.mxu0 %v5466_v46  ;;  %2539 = vmatpush1.bf16.msra.mxu1 %v5524_v29  ;;  %v5593_v46 = vld [vmem:[#allocation7 + $0x158] ss:$28 sps:$4 sm:$0xff]  }
 0x20e   :  { %2540 = vmatprep.subr.bf16.mxu1 %v5529_v30  ;;  %v5545_v29 = vld [vmem:[#allocation6 + $0xa8] ss:$16 sps:$4 sm:$0xff]   ;;  %v5550_v30 = vld [vmem:[#allocation6 + $0xcc] ss:$16 sps:$4 sm:$0xff]  }
 0x210   :  { %2267 = vmatpush1.bf16.msra.mxu0 %v5464_v47  ;;  %v5601_v47 = vld [vmem:[#allocation7 + $0x194] ss:$28 sps:$4 sm:$0xff]  }
 0x211   :  { %2268 = vmatprep.subr.bf16.mxu0 %v5469_v48  ;;  %2541 = vmatpush1.bf16.msra.mxu1 %v5527_v31  ;;  %v5599_v48 = vld [vmem:[#allocation7 + $0x190] ss:$28 sps:$4 sm:$0xff]  }
 0x212   :  { %2567 = vmatprep.subr.bf16.mxu1 %v5532_v32  ;;  %v5553_v31 = vld [vmem:[#allocation6 + $0xec] ss:$16 sps:$4 sm:$0xff]   ;;  %v5551_v32 = vld [vmem:[#allocation6 + $0xe8] ss:$16 sps:$4 sm:$0xff]  }
 0x214   :  { %2269 = vmatpush1.bf16.msra.mxu0 %v5467_v49  ;;  %v5607_v49 = vld [vmem:[#allocation7 + $0x1cc] ss:$28 sps:$4 sm:$0xff]  }
 0x215   :  { %2270 = vmatprep.subr.bf16.mxu0 %v5472_v50  ;;  %v5605_v50 = vld [vmem:[#allocation7 + $0x1c8] ss:$28 sps:$4 sm:$0xff]  }
 0x218   :  { %2271 = vmatpush1.bf16.msra.mxu0 %v5470_v51  ;;  %v5613_v51 = vld [vmem:[#allocation7 + $0x204] ss:$28 sps:$4 sm:$0xff]  }
 0x219   :  { %2272 = vmatprep.subr.bf16.mxu0 %v5475_v52  ;;  %v5611_v52 = vld [vmem:[#allocation7 + $0x200] ss:$28 sps:$4 sm:$0xff]  }
 0x21c   :  { %2273 = vmatpush1.bf16.msra.mxu0 %v5473_v53  ;;  %v5619_v53 = vld [vmem:[#allocation7 + $0x23c] ss:$28 sps:$4 sm:$0xff]  }
 0x21d   :  { %2274 = vmatprep.subr.bf16.mxu0 %v5478_v54  ;;  %v5617_v54 = vld [vmem:[#allocation7 + $0x238] ss:$28 sps:$4 sm:$0xff]  }
 0x220   :  { %2275 = vmatpush1.bf16.msra.mxu0 %v5476_v55  ;;  %v5625_v55 = vld [vmem:[#allocation7 + $0x274] ss:$28 sps:$4 sm:$0xff]  }
 0x221   :  { %2276 = vmatprep.subr.bf16.mxu0 %v5481_v56  ;;  %v5623_v56 = vld [vmem:[#allocation7 + $0x270] ss:$28 sps:$4 sm:$0xff]  }
 0x224   :  { %2277 = vmatpush1.bf16.msra.mxu0 %v5479_v57  ;;  %v5631_v57 = vld [vmem:[#allocation7 + $0x2ac] ss:$28 sps:$4 sm:$0xff]  }
 0x225   :  { %2278 = vmatprep.subr.bf16.mxu0 %v5484_v58  ;;  %v5629_v58 = vld [vmem:[#allocation7 + $0x2a8] ss:$28 sps:$4 sm:$0xff]  }
 0x228   :  { %2279 = vmatpush1.bf16.msra.mxu0 %v5482_v59  ;;  %v5637_v59 = vld [vmem:[#allocation7 + $0x2e4] ss:$28 sps:$4 sm:$0xff]  }
 0x229   :  { %2280 = vmatprep.subr.bf16.mxu0 %v5487_v60  ;;  %v5635_v60 = vld [vmem:[#allocation7 + $0x2e0] ss:$28 sps:$4 sm:$0xff]  }
 0x22c   :  { %2281 = vmatpush1.bf16.msra.mxu0 %v5485_v61  ;;  %v1889_v61 = vld [vmem:[%s6249_s5] sm:$0x3] }
 0x22d   :  { %2282 = vmatprep.subr.bf16.mxu0 %v5490_v62  ;;  %v1894_v62 = vrot.slane %v1889_v61, %v6131_v19 }
 0x230   :  { %2283 = vmatpush1.bf16.msra.mxu0 %v5488_v63  ;;  %v1898_v63 = vrot.slane %v1889_v61, %v6139_v21  ;;  %v5640_v61 = vld [vmem:[#allocation7 + $0x314] ss:$28 sps:$4 sm:$0xff]  }
 0x231   :  { %2284 = vmatprep.subr.bf16.mxu0 %v5493_v0 }
 0x234   :  { %2285 = vmatpush1.bf16.msra.mxu0 %v5491_v1 }
 0x235   :  { %2286 = vmatprep.subr.bf16.mxu0 %v5496_v2 }
 0x238   :  { %2287 = vmatpush1.bf16.msra.mxu0 %v5494_v3 }
 0x239   :  { %2288 = vmatprep.subr.bf16.mxu0 %v5499_v5 }
 0x23c   :  { %2289 = vmatpush1.bf16.msra.mxu0 %v5497_v6 }
 0x23d   :  { %2290 = vmatprep.subr.bf16.mxu0 %v5502_v8 }
 0x240   :  { %2291 = vmatpush1.bf16.msra.mxu0 %v5500_v9  ;;  %v2305_v9 = vld [vmem:[%s6245_s1] sm:$0xff] }
 0x241   :  { %2292 = vmatprep.subr.bf16.mxu0 %v5505_v12 }
 0x244   :  { %2293 = vmatpush1.bf16.msra.mxu0 %v5503_v13 }
 0x245   :  { %4143 = vmatprep.subr.bf16.mxu0 %v5559_v34  ;;  %v5554_v34 = vld [vmem:[#allocation7] ss:$28 sps:$4 sm:$0xff]  }
 0x247   :  { %2295 = vmatmul.mubr.bf16.vlgmr.msra.gmra.mrb[4].mxu0 %v1823_v15 }
 0x248   :  { %4144 = vmatpush1.bf16.msra.mxu0 %v5557_v33  ;;  %v5556_v33 = vld [vmem:[#allocation7 + $0x4] ss:$28 sps:$4 sm:$0xff]  }
 0x249   :  { %4145 = vmatprep.subr.bf16.mxu0 %v5565_v35  ;;  %v5562_v35 = vld [vmem:[#allocation7 + $0x3c] ss:$28 sps:$4 sm:$0xff]  }
 0x24c   :  { %4146 = vmatpush1.bf16.msra.mxu0 %v5563_v36  ;;  %v5560_v36 = vld [vmem:[#allocation7 + $0x38] ss:$28 sps:$4 sm:$0xff]  }
 0x24d   :  { %4147 = vmatprep.subr.bf16.mxu0 %v5571_v37  ;;  %v5568_v37 = vld [vmem:[#allocation7 + $0x74] ss:$28 sps:$4 sm:$0xff]  }
 0x250   :  { %4148 = vmatpush1.bf16.msra.mxu0 %v5569_v38  ;;  %v5566_v38 = vld [vmem:[#allocation7 + $0x70] ss:$28 sps:$4 sm:$0xff]  }
 0x251   :  { %4149 = vmatprep.subr.bf16.mxu0 %v5577_v39  ;;  %v5574_v39 = vld [vmem:[#allocation7 + $0xac] ss:$28 sps:$4 sm:$0xff]  }
 0x254   :  { %4150 = vmatpush1.bf16.msra.mxu0 %v5575_v40  ;;  %v5572_v40 = vld [vmem:[#allocation7 + $0xa8] ss:$28 sps:$4 sm:$0xff]  }
 0x255   :  { %4151 = vmatprep.subr.bf16.mxu0 %v5583_v41  ;;  %v5580_v41 = vld [vmem:[#allocation7 + $0xe4] ss:$28 sps:$4 sm:$0xff]  }
 0x258   :  { %4152 = vmatpush1.bf16.msra.mxu0 %v5581_v42  ;;  %v5578_v42 = vld [vmem:[#allocation7 + $0xe0] ss:$28 sps:$4 sm:$0xff]  }
 0x259   :  { %4153 = vmatprep.subr.bf16.mxu0 %v5589_v43  ;;  %v5586_v43 = vld [vmem:[#allocation7 + $0x11c] ss:$28 sps:$4 sm:$0xff]  }
 0x25c   :  { %4154 = vmatpush1.bf16.msra.mxu0 %v5587_v44  ;;  %v5584_v44 = vld [vmem:[#allocation7 + $0x118] ss:$28 sps:$4 sm:$0xff]  }
 0x25d   :  { %4155 = vmatprep.subr.bf16.mxu0 %v5595_v45  ;;  %v5592_v45 = vld [vmem:[#allocation7 + $0x154] ss:$28 sps:$4 sm:$0xff]  }
 0x260   :  { %4156 = vmatpush1.bf16.msra.mxu0 %v5593_v46  ;;  %v5590_v46 = vld [vmem:[#allocation7 + $0x150] ss:$28 sps:$4 sm:$0xff]  }
 0x261   :  { %4157 = vmatprep.subr.bf16.mxu0 %v5601_v47  ;;  %v5598_v47 = vld [vmem:[#allocation7 + $0x18c] ss:$28 sps:$4 sm:$0xff]  }
 0x264   :  { %4158 = vmatpush1.bf16.msra.mxu0 %v5599_v48  ;;  %v5596_v48 = vld [vmem:[#allocation7 + $0x188] ss:$28 sps:$4 sm:$0xff]  }
 0x265   :  { %4159 = vmatprep.subr.bf16.mxu0 %v5607_v49  ;;  %v5604_v49 = vld [vmem:[#allocation7 + $0x1c4] ss:$28 sps:$4 sm:$0xff]  }
 0x268   :  { %4160 = vmatpush1.bf16.msra.mxu0 %v5605_v50  ;;  %v5602_v50 = vld [vmem:[#allocation7 + $0x1c0] ss:$28 sps:$4 sm:$0xff]  }
 0x269   :  { %4161 = vmatprep.subr.bf16.mxu0 %v5613_v51  ;;  %v5610_v51 = vld [vmem:[#allocation7 + $0x1fc] ss:$28 sps:$4 sm:$0xff]  }
 0x26c   :  { %4162 = vmatpush1.bf16.msra.mxu0 %v5611_v52  ;;  %v5608_v52 = vld [vmem:[#allocation7 + $0x1f8] ss:$28 sps:$4 sm:$0xff]  }
 0x26d   :  { %4163 = vmatprep.subr.bf16.mxu0 %v5619_v53  ;;  %v5616_v53 = vld [vmem:[#allocation7 + $0x234] ss:$28 sps:$4 sm:$0xff]  }
 0x270   :  { %4164 = vmatpush1.bf16.msra.mxu0 %v5617_v54  ;;  %v5614_v54 = vld [vmem:[#allocation7 + $0x230] ss:$28 sps:$4 sm:$0xff]  }
 0x271   :  { %4165 = vmatprep.subr.bf16.mxu0 %v5625_v55  ;;  %v5622_v55 = vld [vmem:[#allocation7 + $0x26c] ss:$28 sps:$4 sm:$0xff]  }
 0x274   :  { %4166 = vmatpush1.bf16.msra.mxu0 %v5623_v56  ;;  %v5620_v56 = vld [vmem:[#allocation7 + $0x268] ss:$28 sps:$4 sm:$0xff]  }
 0x275   :  { %4167 = vmatprep.subr.bf16.mxu0 %v5631_v57  ;;  %v5628_v57 = vld [vmem:[#allocation7 + $0x2a4] ss:$28 sps:$4 sm:$0xff]  }
 0x278   :  { %4168 = vmatpush1.bf16.msra.mxu0 %v5629_v58  ;;  %v5626_v58 = vld [vmem:[#allocation7 + $0x2a0] ss:$28 sps:$4 sm:$0xff]  }
 0x279   :  { %4169 = vmatprep.subr.bf16.mxu0 %v5637_v59  ;;  %v5634_v59 = vld [vmem:[#allocation7 + $0x2dc] ss:$28 sps:$4 sm:$0xff]  }
 0x27c   :  { %4170 = vmatpush1.bf16.msra.mxu0 %v5635_v60  ;;  %v5632_v60 = vld [vmem:[#allocation7 + $0x2d8] ss:$28 sps:$4 sm:$0xff]  }
 0x31a   :  { %v2296_v0 = vpop.f32.mrb[4].mxu0 }
 0x31b   :  { %v5008_v1 = vadd.f32 %v2296_v0, %v1894_v62  ;;  %v2298_v2 = vpop.f32.mrb[5].mxu0  ;;  %v5643_v62 = vld [vmem:[#allocation7 + $0x31c] ss:$28 sps:$4 sm:$0xff]   ;;  %v5638_v0 = vld [vmem:[#allocation7 + $0x310] ss:$28 sps:$4 sm:$0xff]  }
 0x31c   :  { %v5009_v3 = vadd.f32 %v2298_v2, %v1898_v63  ;;  %v2300_v5 = vpop.f32.mrb[6].mxu0  ;;  %v5641_v63 = vld [vmem:[#allocation7 + $0x318] ss:$28 sps:$4 sm:$0xff]   ;;  %4171 = vmatprep.subr.bf16.mxu0 %v5643_v62  ;;  %v5703_v62 = vld [vmem:[#allocation7 + $0x54c] ss:$28 sps:$4 sm:$0xff]  }
 0x31d   :  { %2303 = vst [vmem:[%s6255_s11] sm:$0xff] %v5008_v1  ;;  %v2301_v6 = vpop.f32.mrb[7].mxu0  ;;  %4172 = vmatpush1.bf16.msra.mxu0 %v5641_v63  ;;  %v5649_v2 = vld [vmem:[#allocation7 + $0x354] ss:$28 sps:$4 sm:$0xff]   ;;  %v5644_v5 = vld [vmem:[#allocation7 + $0x348] ss:$28 sps:$4 sm:$0xff]  }
 0x31e   :  { %2304 = vst [vmem:[%s6256_s12] sm:$0xff] %v5009_v3  ;;  %v2306_v7 = vmul.f32 0.5, %v5009_v3  ;;  %v5647_v3 = vld [vmem:[#allocation7 + $0x350] ss:$28 sps:$4 sm:$0xff]   ;;  %4173 = vmatprep.subr.bf16.mxu0 %v5649_v2  ;;  %v5652_v6 = vld [vmem:[#allocation7 + $0x384] ss:$28 sps:$4 sm:$0xff]  }
 0x31f   :  { %v5701_v2 = vld [vmem:[#allocation7 + $0x548] ss:$28 sps:$4 sm:$0xff]  }
 0x320   :  { %v2307_v8 = vmul.f32 1.442695, %v2306_v7  ;;  %v5655_v7 = vld [vmem:[#allocation7 + $0x38c] ss:$28 sps:$4 sm:$0xff]  }
 0x321   :  { %4174 = vmatpush1.bf16.msra.mxu0 %v5647_v3  ;;  %v5706_v3 = vld [vmem:[#allocation7 + $0x57c] ss:$28 sps:$4 sm:$0xff]  }
 0x322   :  { %5874 = vpow2.f32 %v2307_v8  ;;  %4184 = vmatprep.subr.bf16.mxu0 %v5655_v7  ;;  %v6176_v8 = vld [vmem:[%s6251_s7] sm:$0xf] }
 0x323   :  { %v5707_v7 = vld [vmem:[#allocation7 + $0x580] ss:$28 sps:$4 sm:$0xff]  }
 0x32c   :  { %v5875_v10 = vpop.eup %5874 }
 0x32d   :  { %v2309_v12 = vmul.f32 %v5875_v10, %v2305_v9  ;;  %v2349_v9 = vrot.slane %v6176_v8, %v6131_v19  ;;  %v2353_v10 = vrot.slane %v6176_v8, %v6139_v21 }
 0x32f   :  { %v2310_v13 = vadd.f32 %v5008_v1, %v2309_v12  ;;  %v5646_v1 = vld [vmem:[#allocation7 + $0x34c] ss:$28 sps:$4 sm:$0xff]  }
 0x331   :  { %v2311_v15 = vpack.c.bf16 %v2310_v13, %v2310_v13 }
 0x333   :  { %2559 = vmatmul.mubr.bf16.vlgmr.msra.gmra.mrb[4].mxu1 %v2311_v15 }
 0x334   :  { %2568 = vmatpush1.bf16.msra.mxu1 %v5530_v14  ;;  %2599 = vmatprep.mubr.bf16.mxu1 %v5980_v22  ;;  %v5548_v22 = vld [vmem:[#allocation6 + $0xc8] ss:$16 sps:$4 sm:$0xff]  }
 0x335   :  { %2569 = vmatprep.subr.bf16.mxu1 %v5535_v16 }
 0x338   :  { %2570 = vmatpush1.bf16.msra.mxu1 %v5533_v17 }
 0x339   :  { %2571 = vmatprep.subr.bf16.mxu1 %v5538_v20 }
 0x33c   :  { %2572 = vmatpush1.bf16.msra.mxu1 %v5536_v23 }
 0x33d   :  { %2573 = vmatprep.subr.bf16.mxu1 %v5541_v24 }
 0x340   :  { %2574 = vmatpush1.bf16.msra.mxu1 %v5539_v25  ;;  %v5650_v25 = vld [vmem:[#allocation7 + $0x380] ss:$28 sps:$4 sm:$0xff]  }
 0x341   :  { %2575 = vmatprep.subr.bf16.mxu1 %v5544_v26  ;;  %v5653_v26 = vld [vmem:[#allocation7 + $0x388] ss:$28 sps:$4 sm:$0xff]  }
 0x344   :  { %2576 = vmatpush1.bf16.msra.mxu1 %v5542_v27 }
 0x345   :  { %2577 = vmatprep.subr.bf16.mxu1 %v5547_v28  ;;  %v5658_v28 = vld [vmem:[#allocation7 + $0x3bc] ss:$28 sps:$4 sm:$0xff]  }
 0x348   :  { %2578 = vmatpush1.bf16.msra.mxu1 %v5545_v29  ;;  %v5661_v29 = vld [vmem:[#allocation7 + $0x3c4] ss:$28 sps:$4 sm:$0xff]  }
 0x349   :  { %2579 = vmatprep.subr.bf16.mxu1 %v5550_v30  ;;  %v5656_v30 = vld [vmem:[#allocation7 + $0x3b8] ss:$28 sps:$4 sm:$0xff]  }
 0x34c   :  { %2580 = vmatpush1.bf16.msra.mxu1 %v5548_v22  ;;  %v5659_v22 = vld [vmem:[#allocation7 + $0x3c0] ss:$28 sps:$4 sm:$0xff]  }
 0x34d   :  { %2581 = vmatprep.subr.bf16.mxu1 %v5553_v31  ;;  %v5664_v31 = vld [vmem:[#allocation7 + $0x3f4] ss:$28 sps:$4 sm:$0xff]  }
 0x350   :  { %2582 = vmatpush1.bf16.msra.mxu1 %v5551_v32  ;;  %v5667_v32 = vld [vmem:[#allocation7 + $0x3fc] ss:$28 sps:$4 sm:$0xff]  }
 0x351   :  { %4061 = vmatprep.subr.bf16.mxu1 %v5556_v33  ;;  %v5662_v33 = vld [vmem:[#allocation7 + $0x3f0] ss:$28 sps:$4 sm:$0xff]  }
 0x353   :  { %2600 = vmatmul.mubr.bf16.vlgmr.msra.gmra.mrb[8].mxu1 %v2311_v15 }
 0x354   :  { %4062 = vmatpush1.bf16.msra.mxu1 %v5554_v34  ;;  %v5665_v34 = vld [vmem:[#allocation7 + $0x3f8] ss:$28 sps:$4 sm:$0xff]  }
 0x355   :  { %4063 = vmatprep.subr.bf16.mxu1 %v5562_v35  ;;  %v5670_v35 = vld [vmem:[#allocation7 + $0x42c] ss:$28 sps:$4 sm:$0xff]  }
 0x358   :  { %4064 = vmatpush1.bf16.msra.mxu1 %v5560_v36  ;;  %v5673_v36 = vld [vmem:[#allocation7 + $0x434] ss:$28 sps:$4 sm:$0xff]  }
 0x359   :  { %4065 = vmatprep.subr.bf16.mxu1 %v5568_v37  ;;  %v5668_v37 = vld [vmem:[#allocation7 + $0x428] ss:$28 sps:$4 sm:$0xff]  }
 0x35c   :  { %4066 = vmatpush1.bf16.msra.mxu1 %v5566_v38  ;;  %v5671_v38 = vld [vmem:[#allocation7 + $0x430] ss:$28 sps:$4 sm:$0xff]  }
 0x35d   :  { %4067 = vmatprep.subr.bf16.mxu1 %v5574_v39  ;;  %v5676_v39 = vld [vmem:[#allocation7 + $0x464] ss:$28 sps:$4 sm:$0xff]  }
 0x360   :  { %4068 = vmatpush1.bf16.msra.mxu1 %v5572_v40  ;;  %v5679_v40 = vld [vmem:[#allocation7 + $0x46c] ss:$28 sps:$4 sm:$0xff]  }
 0x361   :  { %4069 = vmatprep.subr.bf16.mxu1 %v5580_v41  ;;  %v5674_v41 = vld [vmem:[#allocation7 + $0x460] ss:$28 sps:$4 sm:$0xff]  }
 0x364   :  { %4070 = vmatpush1.bf16.msra.mxu1 %v5578_v42  ;;  %v5677_v42 = vld [vmem:[#allocation7 + $0x468] ss:$28 sps:$4 sm:$0xff]  }
 0x365   :  { %4071 = vmatprep.subr.bf16.mxu1 %v5586_v43  ;;  %v5682_v43 = vld [vmem:[#allocation7 + $0x49c] ss:$28 sps:$4 sm:$0xff]  }
 0x368   :  { %4072 = vmatpush1.bf16.msra.mxu1 %v5584_v44  ;;  %v5685_v44 = vld [vmem:[#allocation7 + $0x4a4] ss:$28 sps:$4 sm:$0xff]  }
 0x369   :  { %4073 = vmatprep.subr.bf16.mxu1 %v5592_v45  ;;  %v5680_v45 = vld [vmem:[#allocation7 + $0x498] ss:$28 sps:$4 sm:$0xff]  }
 0x36c   :  { %4074 = vmatpush1.bf16.msra.mxu1 %v5590_v46  ;;  %v5683_v46 = vld [vmem:[#allocation7 + $0x4a0] ss:$28 sps:$4 sm:$0xff]  }
 0x36d   :  { %4075 = vmatprep.subr.bf16.mxu1 %v5598_v47  ;;  %v5688_v47 = vld [vmem:[#allocation7 + $0x4d4] ss:$28 sps:$4 sm:$0xff]  }
 0x370   :  { %4076 = vmatpush1.bf16.msra.mxu1 %v5596_v48  ;;  %v5691_v48 = vld [vmem:[#allocation7 + $0x4dc] ss:$28 sps:$4 sm:$0xff]  }
 0x371   :  { %4077 = vmatprep.subr.bf16.mxu1 %v5604_v49  ;;  %v2361_v49 = vrot.slane %v6176_v8, %v6142_v11 }
 0x374   :  { %4078 = vmatpush1.bf16.msra.mxu1 %v5602_v50  ;;  %v5686_v50 = vld [vmem:[#allocation7 + $0x4d0] ss:$28 sps:$4 sm:$0xff]  }
 0x375   :  { %4079 = vmatprep.subr.bf16.mxu1 %v5610_v51  ;;  %v5689_v51 = vld [vmem:[#allocation7 + $0x4d8] ss:$28 sps:$4 sm:$0xff]  }
 0x378   :  { %4080 = vmatpush1.bf16.msra.mxu1 %v5608_v52  ;;  %v5694_v52 = vld [vmem:[#allocation7 + $0x50c] ss:$28 sps:$4 sm:$0xff]  }
 0x379   :  { %4081 = vmatprep.subr.bf16.mxu1 %v5616_v53  ;;  %v5697_v53 = vld [vmem:[#allocation7 + $0x514] ss:$28 sps:$4 sm:$0xff]  }
 0x37c   :  { %4082 = vmatpush1.bf16.msra.mxu1 %v5614_v54 }
 0x37d   :  { %4083 = vmatprep.subr.bf16.mxu1 %v5622_v55 }
 0x380   :  { %4084 = vmatpush1.bf16.msra.mxu1 %v5620_v56 }
 0x381   :  { %4085 = vmatprep.subr.bf16.mxu1 %v5628_v57 }
 0x384   :  { %4086 = vmatpush1.bf16.msra.mxu1 %v5626_v58  ;;  %v5692_v58 = vld [vmem:[#allocation7 + $0x508] ss:$28 sps:$4 sm:$0xff]  }
 0x385   :  { %4087 = vmatprep.subr.bf16.mxu1 %v5634_v59  ;;  %v5695_v59 = vld [vmem:[#allocation7 + $0x510] ss:$28 sps:$4 sm:$0xff]  }
 0x388   :  { %4088 = vmatpush1.bf16.msra.mxu1 %v5632_v60 }
 0x389   :  { %4089 = vmatprep.subr.bf16.mxu1 %v5640_v61  ;;  %v5700_v61 = vld [vmem:[#allocation7 + $0x544] ss:$28 sps:$4 sm:$0xff]  }
 0x38c   :  { %4090 = vmatpush1.bf16.msra.mxu1 %v5638_v0 }
 0x38d   :  { %4091 = vmatprep.subr.bf16.mxu1 %v5646_v1  ;;  %v5698_v1 = vld [vmem:[#allocation7 + $0x540] ss:$28 sps:$4 sm:$0xff]  }
 0x390   :  { %4092 = vmatpush1.bf16.msra.mxu1 %v5644_v5  ;;  %v5709_v5 = vld [vmem:[#allocation7 + $0x584] ss:$28 sps:$4 sm:$0xff]  }
 0x391   :  { %4102 = vmatprep.subr.bf16.mxu1 %v5652_v6  ;;  %v5704_v6 = vld [vmem:[#allocation7 + $0x578] ss:$28 sps:$4 sm:$0xff]  }
 0x406   :  { %v2560_v12 = vpop.f32.mrb[4].mxu1 }
 0x407   :  { %v2561_v13 = vadd.f32 %v2560_v12, %v2349_v9  ;;  %v2562_v14 = vpop.f32.mrb[5].mxu1  ;;  %v5712_v9 = vld [vmem:[#allocation7 + $0x5b4] ss:$28 sps:$4 sm:$0xff]  }
 0x408   :  { %v2563_v15 = vadd.f32 %v2562_v14, %v2353_v10  ;;  %v2564_v16 = vpop.f32.mrb[6].mxu1  ;;  %v5715_v10 = vld [vmem:[#allocation7 + $0x5bc] ss:$28 sps:$4 sm:$0xff]   ;;  %v5710_v12 = vld [vmem:[#allocation7 + $0x5b0] ss:$28 sps:$4 sm:$0xff]  }
 0x409   :  { %v2608_v17 = vmax.f32 %v2561_v13, 0.0  ;;  %v2565_v20 = vpop.f32.mrb[7].mxu1  ;;  %v5713_v13 = vld [vmem:[#allocation7 + $0x5b8] ss:$28 sps:$4 sm:$0xff]   ;;  %v5718_v14 = vld [vmem:[#allocation7 + $0x5ec] ss:$28 sps:$4 sm:$0xff]  }
 0x40a   :  { %v2609_v23 = vmax.f32 %v2563_v15, 0.0  ;;  %v5721_v15 = vld [vmem:[#allocation7 + $0x5f4] ss:$28 sps:$4 sm:$0xff]   ;;  %v5716_v16 = vld [vmem:[#allocation7 + $0x5e8] ss:$28 sps:$4 sm:$0xff]  }
 0x40b   :  { %v6184_v27 = vpack.c.bf16 %v2608_v17, %v2608_v17  ;;  %v5719_v17 = vld [vmem:[#allocation7 + $0x5f0] ss:$28 sps:$4 sm:$0xff]   ;;  %v5724_v20 = vld [vmem:[#allocation7 + $0x624] ss:$28 sps:$4 sm:$0xff]  }
 0x40c   :  { %v6182_v24 = vpack.c.bf16 %v2609_v23, %v2609_v23  ;;  %v5727_v23 = vld [vmem:[#allocation7 + $0x62c] ss:$28 sps:$4 sm:$0xff]  }
 0x40e   :  { %4093 = vmatprep.mubr.bf16.mxu1 %v6182_v24  ;;  %4175 = vmatprep.mubr.bf16.mxu0 %v6182_v24 }
 0x40f   :  { %4094 = vmatmul.mubr.bf16.vlgmr.msra.gmra.mrb[12].mxu1 %v6184_v27  ;;  %4176 = vmatmul.mubr.bf16.vlgmr.msra.gmra.mrb[8].mxu0 %v6184_v27 }
 0x410   :  { %4103 = vmatpush1.bf16.msra.mxu1 %v5650_v25  ;;  %4185 = vmatpush1.bf16.msra.mxu0 %v5653_v26  ;;  %v5722_v25 = vld [vmem:[#allocation7 + $0x620] ss:$28 sps:$4 sm:$0xff]   ;;  %v5725_v26 = vld [vmem:[#allocation7 + $0x628] ss:$28 sps:$4 sm:$0xff]  }
 0x411   :  { %4104 = vmatprep.subr.bf16.mxu1 %v5658_v28  ;;  %4186 = vmatprep.subr.bf16.mxu0 %v5661_v29  ;;  %v5730_v28 = vld [vmem:[#allocation7 + $0x65c] ss:$28 sps:$4 sm:$0xff]   ;;  %v5733_v29 = vld [vmem:[#allocation7 + $0x664] ss:$28 sps:$4 sm:$0xff]  }
 0x414   :  { %4105 = vmatpush1.bf16.msra.mxu1 %v5656_v30  ;;  %4187 = vmatpush1.bf16.msra.mxu0 %v5659_v22  ;;  %v5728_v30 = vld [vmem:[#allocation7 + $0x658] ss:$28 sps:$4 sm:$0xff]   ;;  %v5731_v22 = vld [vmem:[#allocation7 + $0x660] ss:$28 sps:$4 sm:$0xff]  }
 0x415   :  { %4106 = vmatprep.subr.bf16.mxu1 %v5664_v31  ;;  %4188 = vmatprep.subr.bf16.mxu0 %v5667_v32  ;;  %v2357_v31 = vrot.slane %v6176_v8, %v6153_v4  ;;  %v5736_v32 = vld [vmem:[#allocation7 + $0x694] ss:$28 sps:$4 sm:$0xff]  }
 0x416   :  { %v5748_v8 = vld [vmem:[#allocation7 + $0x14] ss:$28 sps:$4 sm:$0xff]  }
 0x418   :  { %4107 = vmatpush1.bf16.msra.mxu1 %v5662_v33  ;;  %4189 = vmatpush1.bf16.msra.mxu0 %v5665_v34  ;;  %v5739_v33 = vld [vmem:[#allocation7 + $0x69c] ss:$28 sps:$4 sm:$0xff]   ;;  %v5734_v34 = vld [vmem:[#allocation7 + $0x690] ss:$28 sps:$4 sm:$0xff]  }
 0x419   :  { %4108 = vmatprep.subr.bf16.mxu1 %v5670_v35  ;;  %4190 = vmatprep.subr.bf16.mxu0 %v5673_v36  ;;  %v5737_v35 = vld [vmem:[#allocation7 + $0x698] ss:$28 sps:$4 sm:$0xff]  }
 0x41c   :  { %4109 = vmatpush1.bf16.msra.mxu1 %v5668_v37  ;;  %4191 = vmatpush1.bf16.msra.mxu0 %v5671_v38  ;;  %v5742_v37 = vld [vmem:[#allocation7 + $0x6cc] ss:$28 sps:$4 sm:$0xff]   ;;  %v5745_v38 = vld [vmem:[#allocation7 + $0x6d4] ss:$28 sps:$4 sm:$0xff]  }
 0x41d   :  { %4110 = vmatprep.subr.bf16.mxu1 %v5676_v39  ;;  %4192 = vmatprep.subr.bf16.mxu0 %v5679_v40  ;;  %v5740_v39 = vld [vmem:[#allocation7 + $0x6c8] ss:$28 sps:$4 sm:$0xff]   ;;  %v5743_v40 = vld [vmem:[#allocation7 + $0x6d0] ss:$28 sps:$4 sm:$0xff]  }
 0x420   :  { %4111 = vmatpush1.bf16.msra.mxu1 %v5674_v41  ;;  %4193 = vmatpush1.bf16.msra.mxu0 %v5677_v42  ;;  %v5749_v42 = vld [vmem:[#allocation7 + $0x1d8] ss:$28 sps:$4 sm:$0xff]  }
 0x421   :  { %4112 = vmatprep.subr.bf16.mxu1 %v5682_v43  ;;  %4194 = vmatprep.subr.bf16.mxu0 %v5685_v44  ;;  %v5746_v43 = vld [vmem:[#allocation7 + $0x10] ss:$28 sps:$4 sm:$0xff]  }
 0x424   :  { %4113 = vmatpush1.bf16.msra.mxu1 %v5680_v45  ;;  %4195 = vmatpush1.bf16.msra.mxu0 %v5683_v46  ;;  %v5750_v45 = vld [vmem:[#allocation7 + $0x18] ss:$28 sps:$4 sm:$0xff]   ;;  %v5753_v46 = vld [vmem:[#allocation7 + $0x4c] ss:$28 sps:$4 sm:$0xff]  }
 0x425   :  { %4114 = vmatprep.subr.bf16.mxu1 %v5688_v47  ;;  %4196 = vmatprep.subr.bf16.mxu0 %v5691_v48  ;;  %v5754_v47 = vld [vmem:[#allocation7 + $0x210] ss:$28 sps:$4 sm:$0xff]   ;;  %v5751_v48 = vld [vmem:[#allocation7 + $0x48] ss:$28 sps:$4 sm:$0xff]  }
 0x426   :  { %v6192_v54 = vpop.f32.mrb[8].mxu1 }
 0x427   :  { %v2603_v55 = vpop.f32.mrb[9].mxu1  ;;  %v2602_v36 = vadd.f32 %v6192_v54, %v2357_v31  ;;  %v5763_v54 = vld [vmem:[#allocation7 + $0xbc] ss:$28 sps:$4 sm:$0xff]  }
 0x428   :  { %v2604_v56 = vadd.f32 %v2603_v55, %v2361_v49  ;;  %v2605_v57 = vpop.f32.mrb[10].mxu1  ;;  %4115 = vmatpush1.bf16.msra.mxu1 %v5686_v50  ;;  %4197 = vmatpush1.bf16.msra.mxu0 %v5689_v51  ;;  %v5755_v49 = vld [vmem:[#allocation7 + $0x50] ss:$28 sps:$4 sm:$0xff]   ;;  %v5758_v50 = vld [vmem:[#allocation7 + $0x84] ss:$28 sps:$4 sm:$0xff]  }
 0x429   :  { %v2606_v60 = vpop.f32.mrb[11].mxu1  ;;  %4116 = vmatprep.subr.bf16.mxu1 %v5694_v52  ;;  %4198 = vmatprep.subr.bf16.mxu0 %v5697_v53  ;;  %v2610_v41 = vmax.f32 %v2602_v36, 0.0  ;;  %v5759_v51 = vld [vmem:[#allocation7 + $0x248] ss:$28 sps:$4 sm:$0xff]   ;;  %v5756_v52 = vld [vmem:[#allocation7 + $0x80] ss:$28 sps:$4 sm:$0xff]  }
 0x42a   :  { %v2611_v63 = vmax.f32 %v2604_v56, 0.0  ;;  %v5760_v53 = vld [vmem:[#allocation7 + $0x88] ss:$28 sps:$4 sm:$0xff]   ;;  %v5764_v55 = vld [vmem:[#allocation7 + $0x280] ss:$28 sps:$4 sm:$0xff]  }
 0x42b   :  { %v6201_v44 = vpack.c.bf16 %v2610_v41, %v2610_v41  ;;  %v5761_v56 = vld [vmem:[#allocation7 + $0xb8] ss:$28 sps:$4 sm:$0xff]   ;;  %v5765_v57 = vld [vmem:[#allocation7 + $0xc0] ss:$28 sps:$4 sm:$0xff]   ;;  %v5806_v36 = vld [vmem:[#allocation7 + $0x2b0] ss:$28 sps:$4 sm:$0xff]  }
 0x42c   :  { %v6194_v0 = vpack.c.bf16 %v2611_v63, %v2611_v63  ;;  %4117 = vmatpush1.bf16.msra.mxu1 %v5692_v58  ;;  %4199 = vmatpush1.bf16.msra.mxu0 %v5695_v59  ;;  %v5768_v58 = vld [vmem:[#allocation7 + $0xf4] ss:$28 sps:$4 sm:$0xff]   ;;  %v5771_v63 = vld [vmem:[#allocation7 + $0x128] ss:$28 sps:$4 sm:$0xff]   ;;  %v5804_v31 = vld [vmem:[#allocation7 + $0x600] ss:$28 sps:$4 sm:$0xff]  }
 0x42d   :  { %4118 = vmatprep.subr.bf16.mxu1 %v5700_v61  ;;  %4200 = vmatprep.subr.bf16.mxu0 %v5703_v62  ;;  %v5766_v59 = vld [vmem:[#allocation7 + $0xf0] ss:$28 sps:$4 sm:$0xff]   ;;  %v5770_v60 = vld [vmem:[#allocation7 + $0xf8] ss:$28 sps:$4 sm:$0xff]  }
 0x42e   :  { %4134 = vmatprep.mubr.bf16.mxu1 %v6194_v0  ;;  %4216 = vmatprep.mubr.bf16.mxu0 %v6194_v0  ;;  %v5773_v61 = vld [vmem:[#allocation7 + $0x12c] ss:$28 sps:$4 sm:$0xff]  }
 0x42f   :  { %v5774_v62 = vld [vmem:[#allocation7 + $0x2f0] ss:$28 sps:$4 sm:$0xff]  }
 0x430   :  { %4119 = vmatpush1.bf16.msra.mxu1 %v5698_v1  ;;  %4201 = vmatpush1.bf16.msra.mxu0 %v5701_v2  ;;  %v5775_v1 = vld [vmem:[#allocation7 + $0x130] ss:$28 sps:$4 sm:$0xff]   ;;  %v5778_v2 = vld [vmem:[#allocation7 + $0x164] ss:$28 sps:$4 sm:$0xff]  }
 0x431   :  { %4120 = vmatprep.subr.bf16.mxu1 %v5706_v3  ;;  %4202 = vmatprep.subr.bf16.mxu0 %v5709_v5  ;;  %v5779_v3 = vld [vmem:[#allocation7 + $0x328] ss:$28 sps:$4 sm:$0xff]   ;;  %v5776_v5 = vld [vmem:[#allocation7 + $0x160] ss:$28 sps:$4 sm:$0xff]   ;;  %v5815_v41 = vld [vmem:[#allocation7 + $0x4b0] ss:$28 sps:$4 sm:$0xff]  }
 0x434   :  { %4121 = vmatpush1.bf16.msra.mxu1 %v5704_v6  ;;  %4203 = vmatpush1.bf16.msra.mxu0 %v5707_v7  ;;  %v5780_v6 = vld [vmem:[#allocation7 + $0x168] ss:$28 sps:$4 sm:$0xff]   ;;  %v5783_v7 = vld [vmem:[#allocation7 + $0x19c] ss:$28 sps:$4 sm:$0xff]  }
 0x435   :  { %4122 = vmatprep.subr.bf16.mxu1 %v5712_v9  ;;  %4204 = vmatprep.subr.bf16.mxu0 %v5715_v10  ;;  %v5784_v9 = vld [vmem:[#allocation7 + $0x360] ss:$28 sps:$4 sm:$0xff]   ;;  %v5781_v10 = vld [vmem:[#allocation7 + $0x198] ss:$28 sps:$4 sm:$0xff]  }
 0x438   :  { %4123 = vmatpush1.bf16.msra.mxu1 %v5710_v12  ;;  %4205 = vmatpush1.bf16.msra.mxu0 %v5713_v13  ;;  %v5785_v12 = vld [vmem:[#allocation7 + $0x1a0] ss:$28 sps:$4 sm:$0xff]   ;;  %v5788_v13 = vld [vmem:[#allocation7 + $0x1d4] ss:$28 sps:$4 sm:$0xff]  }
 0x439   :  { %4124 = vmatprep.subr.bf16.mxu1 %v5718_v14  ;;  %4206 = vmatprep.subr.bf16.mxu0 %v5721_v15  ;;  %v5789_v14 = vld [vmem:[#allocation7 + $0x558] ss:$28 sps:$4 sm:$0xff]   ;;  %v5786_v15 = vld [vmem:[#allocation7 + $0x1d0] ss:$28 sps:$4 sm:$0xff]  }
 0x43c   :  { %4125 = vmatpush1.bf16.msra.mxu1 %v5716_v16  ;;  %4207 = vmatpush1.bf16.msra.mxu0 %v5719_v17  ;;  %v5790_v16 = vld [vmem:[#allocation7 + $0x398] ss:$28 sps:$4 sm:$0xff]   ;;  %v5793_v17 = vld [vmem:[#allocation7 + $0x20c] ss:$28 sps:$4 sm:$0xff]  }
 0x43d   :  { %4126 = vmatprep.subr.bf16.mxu1 %v5724_v20  ;;  %4208 = vmatprep.subr.bf16.mxu0 %v5727_v23  ;;  %v5794_v20 = vld [vmem:[#allocation7 + $0x590] ss:$28 sps:$4 sm:$0xff]   ;;  %v5791_v23 = vld [vmem:[#allocation7 + $0x208] ss:$28 sps:$4 sm:$0xff]  }
 0x440   :  { %4127 = vmatpush1.bf16.msra.mxu1 %v5722_v25  ;;  %4209 = vmatpush1.bf16.msra.mxu0 %v5725_v26  ;;  %v5795_v25 = vld [vmem:[#allocation7 + $0x3d0] ss:$28 sps:$4 sm:$0xff]   ;;  %v5798_v26 = vld [vmem:[#allocation7 + $0x244] ss:$28 sps:$4 sm:$0xff]  }
 0x441   :  { %4128 = vmatprep.subr.bf16.mxu1 %v5730_v28  ;;  %4210 = vmatprep.subr.bf16.mxu0 %v5733_v29  ;;  %v5799_v28 = vld [vmem:[#allocation7 + $0x5c8] ss:$28 sps:$4 sm:$0xff]   ;;  %v5796_v29 = vld [vmem:[#allocation7 + $0x240] ss:$28 sps:$4 sm:$0xff]  }
 0x444   :  { %4129 = vmatpush1.bf16.msra.mxu1 %v5728_v30  ;;  %4211 = vmatpush1.bf16.msra.mxu0 %v5731_v22  ;;  %v5800_v30 = vld [vmem:[#allocation7 + $0x408] ss:$28 sps:$4 sm:$0xff]   ;;  %v5803_v22 = vld [vmem:[#allocation7 + $0x27c] ss:$28 sps:$4 sm:$0xff]  }
 0x445   :  { %4130 = vmatprep.subr.bf16.mxu1 %v5736_v32  ;;  %4212 = vmatprep.subr.bf16.mxu0 %v5739_v33  ;;  %v5801_v32 = vld [vmem:[#allocation7 + $0x278] ss:$28 sps:$4 sm:$0xff]   ;;  %v5805_v33 = vld [vmem:[#allocation7 + $0x440] ss:$28 sps:$4 sm:$0xff]  }
 0x448   :  { %4131 = vmatpush1.bf16.msra.mxu1 %v5734_v34  ;;  %4213 = vmatpush1.bf16.msra.mxu0 %v5737_v35  ;;  %v5808_v34 = vld [vmem:[#allocation7 + $0x2b4] ss:$28 sps:$4 sm:$0xff]  }
 0x449   :  { %4132 = vmatprep.subr.bf16.mxu1 %v5742_v37  ;;  %4214 = vmatprep.subr.bf16.mxu0 %v5745_v38  ;;  %v5809_v35 = vld [vmem:[#allocation7 + $0x638] ss:$28 sps:$4 sm:$0xff]   ;;  %v5813_v38 = vld [vmem:[#allocation7 + $0x2ec] ss:$28 sps:$4 sm:$0xff]  }
 0x44a   :  { %v5810_v37 = vld [vmem:[#allocation7 + $0x478] ss:$28 sps:$4 sm:$0xff]  }
 0x44c   :  { %4133 = vmatpush1.bf16.msra.mxu1 %v5740_v39  ;;  %4215 = vmatpush1.bf16.msra.mxu0 %v5743_v40  ;;  %v5814_v39 = vld [vmem:[#allocation7 + $0x670] ss:$28 sps:$4 sm:$0xff]   ;;  %v5811_v40 = vld [vmem:[#allocation7 + $0x2e8] ss:$28 sps:$4 sm:$0xff]  }
 0x44d   :  { %4225 = vmatprep.subr.bf16.mxu1 %v5748_v8  ;;  %4960 = vmatprep.subr.bf16.mxu0 %v5749_v42  ;;  %v5818_v8 = vld [vmem:[#allocation7 + $0x324] ss:$28 sps:$4 sm:$0xff]  }
 0x44e   :  { %v5819_v42 = vld [vmem:[#allocation7 + $0x6a8] ss:$28 sps:$4 sm:$0xff]  }
 0x44f   :  { %4135 = vmatmul.mubr.bf16.vlgmr.msra.gmra.mrb[12].mxu1 %v6201_v44  ;;  %4217 = vmatmul.mubr.bf16.vlgmr.msra.gmra.mrb[8].mxu0 %v6201_v44 }
 0x450   :  { %4226 = vmatpush1.bf16.msra.mxu1 %v5746_v43  ;;  %4257 = vmatprep.mubr.bf16.mxu1 %v6182_v24  ;;  %v5816_v43 = vld [vmem:[#allocation7 + $0x320] ss:$28 sps:$4 sm:$0xff]  }
 0x451   :  { %4961 = vmatpush3.bf16.msra.mxu0 %v5750_v45  ;;  %4339 = vmatprep.mubr.bf16.mxu0 %v6182_v24  ;;  %v5769_v24 = vld [vmem:[#allocation7 + $0x2b8] ss:$28 sps:$4 sm:$0xff]   ;;  %v5820_v45 = vld [vmem:[#allocation7 + $0x4e8] ss:$28 sps:$4 sm:$0xff]  }
 0x452   :  { %4227 = vmatprep.subr.bf16.mxu1 %v5753_v46  ;;  %4962 = vmatprep.subr.bf16.mxu0 %v5754_v47  ;;  %v5823_v46 = vld [vmem:[#allocation7 + $0x35c] ss:$28 sps:$4 sm:$0xff]  }
 0x453   :  { %v5824_v47 = vld [vmem:[#allocation7 + $0x6e0] ss:$28 sps:$4 sm:$0xff]  }
 0x454   :  { %4228 = vmatpush1.bf16.msra.mxu1 %v5751_v48  ;;  %v5821_v48 = vld [vmem:[#allocation7 + $0x358] ss:$28 sps:$4 sm:$0xff]  }
 0x455   :  { %4963 = vmatpush3.bf16.msra.mxu0 %v5755_v49  ;;  %4229 = vmatprep.subr.bf16.mxu1 %v5758_v50  ;;  %v5825_v49 = vld [vmem:[#allocation7 + $0x520] ss:$28 sps:$4 sm:$0xff]   ;;  %v5828_v50 = vld [vmem:[#allocation7 + $0x394] ss:$28 sps:$4 sm:$0xff]  }
 0x456   :  { %4964 = vmatprep.subr.bf16.mxu0 %v5759_v51  ;;  %v5826_v51 = vld [vmem:[#allocation7 + $0x390] ss:$28 sps:$4 sm:$0xff]  }
 0x458   :  { %4230 = vmatpush1.bf16.msra.mxu1 %v5756_v52  ;;  %v5831_v52 = vld [vmem:[#allocation7 + $0x3cc] ss:$28 sps:$4 sm:$0xff]  }
 0x459   :  { %4965 = vmatpush3.bf16.msra.mxu0 %v5760_v53  ;;  %4231 = vmatprep.subr.bf16.mxu1 %v5763_v54  ;;  %v5829_v53 = vld [vmem:[#allocation7 + $0x3c8] ss:$28 sps:$4 sm:$0xff]  }
 0x45a   :  { %4966 = vmatprep.subr.bf16.mxu0 %v5764_v55  ;;  %v5834_v54 = vld [vmem:[#allocation7 + $0x404] ss:$28 sps:$4 sm:$0xff]  }
 0x45b   :  { %v5832_v55 = vld [vmem:[#allocation7 + $0x400] ss:$28 sps:$4 sm:$0xff]  }
 0x45c   :  { %4232 = vmatpush1.bf16.msra.mxu1 %v5761_v56  ;;  %v5837_v56 = vld [vmem:[#allocation7 + $0x43c] ss:$28 sps:$4 sm:$0xff]  }
 0x45d   :  { %4967 = vmatpush3.bf16.msra.mxu0 %v5765_v57  ;;  %4233 = vmatprep.subr.bf16.mxu1 %v5768_v58  ;;  %v5835_v57 = vld [vmem:[#allocation7 + $0x438] ss:$28 sps:$4 sm:$0xff]  }
 0x45e   :  { %4968 = vmatprep.subr.bf16.mxu0 %v5769_v24  ;;  %v5840_v58 = vld [vmem:[#allocation7 + $0x474] ss:$28 sps:$4 sm:$0xff]  }
 0x45f   :  { %v5838_v24 = vld [vmem:[#allocation7 + $0x470] ss:$28 sps:$4 sm:$0xff]  }
 0x460   :  { %4234 = vmatpush1.bf16.msra.mxu1 %v5766_v59  ;;  %v5841_v59 = vld [vmem:[#allocation7 + $0x4a8] ss:$28 sps:$4 sm:$0xff]  }
 0x461   :  { %4969 = vmatpush3.bf16.msra.mxu0 %v5770_v60  ;;  %4235 = vmatprep.subr.bf16.mxu1 %v5773_v61  ;;  %v5846_v60 = vld [vmem:[#allocation7 + $0x4e4] ss:$28 sps:$4 sm:$0xff]   ;;  %v5849_v61 = vld [vmem:[#allocation7 + $0x51c] ss:$28 sps:$4 sm:$0xff]  }
 0x462   :  { %4970 = vmatprep.subr.bf16.mxu0 %v5774_v62  ;;  %v5847_v62 = vld [vmem:[#allocation7 + $0x518] ss:$28 sps:$4 sm:$0xff]  }
 0x464   :  { %4236 = vmatpush1.bf16.msra.mxu1 %v5771_v63  ;;  %v5852_v63 = vld [vmem:[#allocation7 + $0x554] ss:$28 sps:$4 sm:$0xff]  }
 0x465   :  { %4971 = vmatpush3.bf16.msra.mxu0 %v5775_v1  ;;  %4237 = vmatprep.subr.bf16.mxu1 %v5778_v2  ;;  %v5850_v1 = vld [vmem:[#allocation7 + $0x550] ss:$28 sps:$4 sm:$0xff]  }
 0x466   :  { %4972 = vmatprep.subr.bf16.mxu0 %v5779_v3  ;;  %v5855_v2 = vld [vmem:[#allocation7 + $0x58c] ss:$28 sps:$4 sm:$0xff]  }
 0x467   :  { %v5853_v3 = vld [vmem:[#allocation7 + $0x588] ss:$28 sps:$4 sm:$0xff]  }
 0x468   :  { %4238 = vmatpush1.bf16.msra.mxu1 %v5776_v5  ;;  %v5858_v5 = vld [vmem:[#allocation7 + $0x5c4] ss:$28 sps:$4 sm:$0xff]  }
 0x469   :  { %4973 = vmatpush3.bf16.msra.mxu0 %v5780_v6  ;;  %4239 = vmatprep.subr.bf16.mxu1 %v5783_v7  ;;  %v5856_v6 = vld [vmem:[#allocation7 + $0x5c0] ss:$28 sps:$4 sm:$0xff]  }
 0x46a   :  { %4974 = vmatprep.subr.bf16.mxu0 %v5784_v9  ;;  %v5861_v7 = vld [vmem:[#allocation7 + $0x5fc] ss:$28 sps:$4 sm:$0xff]  }
 0x46b   :  { %v5859_v9 = vld [vmem:[#allocation7 + $0x5f8] ss:$28 sps:$4 sm:$0xff]  }
 0x46c   :  { %4240 = vmatpush1.bf16.msra.mxu1 %v5781_v10  ;;  %v5864_v10 = vld [vmem:[#allocation7 + $0x634] ss:$28 sps:$4 sm:$0xff]  }
 0x46d   :  { %4975 = vmatpush3.bf16.msra.mxu0 %v5785_v12  ;;  %4241 = vmatprep.subr.bf16.mxu1 %v5788_v13  ;;  %v5862_v12 = vld [vmem:[#allocation7 + $0x630] ss:$28 sps:$4 sm:$0xff]  }
 0x46e   :  { %4982 = vmatprep.subr.bf16.mxu0 %v5789_v14  ;;  %v5867_v13 = vld [vmem:[#allocation7 + $0x66c] ss:$28 sps:$4 sm:$0xff]  }
 0x46f   :  { %v5865_v14 = vld [vmem:[#allocation7 + $0x668] ss:$28 sps:$4 sm:$0xff]  }
 0x470   :  { %4340 = vmatmul.mubr.bf16.vlgmr.msra.gmra.mrb[12].mxu0 %v6184_v27  ;;  %4242 = vmatpush1.bf16.msra.mxu1 %v5786_v15  ;;  %v5870_v15 = vld [vmem:[#allocation7 + $0x6a4] ss:$28 sps:$4 sm:$0xff]  }
 0x471   :  { %4983 = vmatpush3.bf16.msra.mxu0 %v5790_v16  ;;  %4379 = vmatprep.mubr.bf16.mxu0 %v6194_v0  ;;  %v5868_v16 = vld [vmem:[#allocation7 + $0x6a0] ss:$28 sps:$4 sm:$0xff]  }
 0x472   :  { %4243 = vmatprep.subr.bf16.mxu1 %v5793_v17  ;;  %4984 = vmatprep.subr.bf16.mxu0 %v5794_v20  ;;  %v5873_v17 = vld [vmem:[#allocation7 + $0x6dc] ss:$28 sps:$4 sm:$0xff]  }
 0x473   :  { %v5871_v20 = vld [vmem:[#allocation7 + $0x6d8] ss:$28 sps:$4 sm:$0xff]  }
 0x474   :  { %4244 = vmatpush1.bf16.msra.mxu1 %v5791_v23  ;;  %v2872_v23 = vld [vmem:[%s6253_s9] sm:$0xff] }
 0x475   :  { %4985 = vmatpush3.bf16.msra.mxu0 %v5795_v25  ;;  %4245 = vmatprep.subr.bf16.mxu1 %v5798_v26  ;;  %v2877_v25 = vrot.slane %v2872_v23, %v6131_v19  ;;  %v2885_v26 = vrot.slane %v2872_v23, %v6153_v4 }
 0x476   :  { %4986 = vmatprep.subr.bf16.mxu0 %v5799_v28  ;;  %v2881_v28 = vrot.slane %v2872_v23, %v6139_v21 }
 0x478   :  { %4246 = vmatpush1.bf16.msra.mxu1 %v5796_v29  ;;  %v2889_v29 = vrot.slane %v2872_v23, %v6142_v11 }
 0x479   :  { %4987 = vmatpush3.bf16.msra.mxu0 %v5800_v30  ;;  %4247 = vmatprep.subr.bf16.mxu1 %v5803_v22 }
 0x47a   :  { %4988 = vmatprep.subr.bf16.mxu0 %v5804_v31 }
 0x47c   :  { %4248 = vmatpush1.bf16.msra.mxu1 %v5801_v32 }
 0x47d   :  { %4989 = vmatpush3.bf16.msra.mxu0 %v5805_v33  ;;  %4249 = vmatprep.subr.bf16.mxu1 %v5808_v34 }
 0x47e   :  { %4990 = vmatprep.subr.bf16.mxu0 %v5809_v35 }
 0x480   :  { %4250 = vmatpush1.bf16.msra.mxu1 %v5806_v36 }
 0x481   :  { %4991 = vmatpush3.bf16.msra.mxu0 %v5810_v37  ;;  %4251 = vmatprep.subr.bf16.mxu1 %v5813_v38 }
 0x482   :  { %4992 = vmatprep.subr.bf16.mxu0 %v5814_v39 }
 0x484   :  { %4252 = vmatpush1.bf16.msra.mxu1 %v5811_v40 }
 0x485   :  { %4993 = vmatpush3.bf16.msra.mxu0 %v5815_v41  ;;  %4253 = vmatprep.subr.bf16.mxu1 %v5818_v8  ;;  %v2900_v41 = vsub.s32 6, %v6128_v18 }
 0x486   :  { %4994 = vmatprep.subr.bf16.mxu0 %v5819_v42 }
 0x487   :  { %v2901_v8 = vrot.slane %v2872_v23, %v2900_v41 }
 0x488   :  { %4254 = vmatpush1.bf16.msra.mxu1 %v5816_v43 }
 0x489   :  { %4995 = vmatpush3.bf16.msra.mxu0 %v5820_v45  ;;  %4255 = vmatprep.subr.bf16.mxu1 %v5823_v46 }
 0x48a   :  { %4996 = vmatprep.subr.bf16.mxu0 %v5824_v47 }
 0x48c   :  { %4256 = vmatpush1.bf16.msra.mxu1 %v5821_v48 }
 0x48d   :  { %4997 = vmatpush3.bf16.msra.mxu0 %v5825_v49  ;;  %4266 = vmatprep.subr.bf16.mxu1 %v5828_v50  ;;  %v2892_v50 = vsub.s32 4, %v6128_v18 }
 0x48f   :  { %4258 = vmatmul.mubr.bf16.vlgmr.msra.gmra.mrb[16].mxu1 %v6184_v27  ;;  %v5843_v27 = vld [vmem:[#allocation7 + $0x4ac] ss:$28 sps:$4 sm:$0xff]  }
 0x490   :  { %4380 = vmatmul.mubr.bf16.vlgmr.msra.gmra.mrb[16].mxu0 %v6201_v44  ;;  %4267 = vmatpush1.bf16.msra.mxu1 %v5826_v51  ;;  %v2896_v51 = vsub.s32 5, %v6128_v18 }
 0x491   :  { %4298 = vmatprep.mubr.bf16.mxu1 %v6194_v0  ;;  %4268 = vmatprep.subr.bf16.mxu1 %v5831_v52  ;;  %v5844_v0 = vld [vmem:[#allocation7 + $0x4e0] ss:$28 sps:$4 sm:$0xff]   ;;  %v2893_v52 = vrot.slane %v2872_v23, %v2892_v50 }
 0x494   :  { %4269 = vmatpush1.bf16.msra.mxu1 %v5829_v53  ;;  %v2897_v53 = vrot.slane %v2872_v23, %v2896_v51 }
 0x495   :  { %4270 = vmatprep.subr.bf16.mxu1 %v5834_v54 }
 0x498   :  { %4271 = vmatpush1.bf16.msra.mxu1 %v5832_v55 }
 0x499   :  { %4272 = vmatprep.subr.bf16.mxu1 %v5837_v56 }
 0x49c   :  { %4273 = vmatpush1.bf16.msra.mxu1 %v5835_v57 }
 0x49d   :  { %4274 = vmatprep.subr.bf16.mxu1 %v5840_v58 }
 0x4a0   :  { %4275 = vmatpush1.bf16.msra.mxu1 %v5838_v24 }
 0x4a1   :  { %4276 = vmatprep.subr.bf16.mxu1 %v5843_v27 }
 0x4a4   :  { %4277 = vmatpush1.bf16.msra.mxu1 %v5841_v59 }
 0x4a5   :  { %4278 = vmatprep.subr.bf16.mxu1 %v5846_v60 }
 0x4a8   :  { %4279 = vmatpush1.bf16.msra.mxu1 %v5844_v0 }
 0x4a9   :  { %4280 = vmatprep.subr.bf16.mxu1 %v5849_v61 }
 0x4ac   :  { %4281 = vmatpush1.bf16.msra.mxu1 %v5847_v62 }
 0x4ad   :  { %4282 = vmatprep.subr.bf16.mxu1 %v5852_v63 }
 0x4b0   :  { %4283 = vmatpush1.bf16.msra.mxu1 %v5850_v1 }
 0x4b1   :  { %4284 = vmatprep.subr.bf16.mxu1 %v5855_v2 }
 0x4b4   :  { %4285 = vmatpush1.bf16.msra.mxu1 %v5853_v3 }
 0x4b5   :  { %4286 = vmatprep.subr.bf16.mxu1 %v5858_v5 }
 0x4b8   :  { %4287 = vmatpush1.bf16.msra.mxu1 %v5856_v6 }
 0x4b9   :  { %4288 = vmatprep.subr.bf16.mxu1 %v5861_v7 }
 0x4bc   :  { %4289 = vmatpush1.bf16.msra.mxu1 %v5859_v9 }
 0x4bd   :  { %4290 = vmatprep.subr.bf16.mxu1 %v5864_v10 }
 0x4c0   :  { %4291 = vmatpush1.bf16.msra.mxu1 %v5862_v12 }
 0x4c1   :  { %4292 = vmatprep.subr.bf16.mxu1 %v5867_v13 }
 0x4c4   :  { %4293 = vmatpush1.bf16.msra.mxu1 %v5865_v14 }
 0x4c5   :  { %4294 = vmatprep.subr.bf16.mxu1 %v5870_v15 }
 0x4c8   :  { %4295 = vmatpush1.bf16.msra.mxu1 %v5868_v16 }
 0x4c9   :  { %4296 = vmatprep.subr.bf16.mxu1 %v5873_v17 }
 0x4cc   :  { %4297 = vmatpush1.bf16.msra.mxu1 %v5871_v20 }
 0x4cf   :  { %4299 = vmatmul.mubr.bf16.vlgmr.msra.gmra.mrb[16].mxu1 %v6201_v44 }
 0x522   :  { %v4136_v30 = vpop.f32.mrb[12].mxu1  ;;  %v4218_v22 = vpop.f32.mrb[8].mxu0 }
 0x523   :  { %v5010_v31 = vadd.f32 %v4136_v30, %v2877_v25  ;;  %v5012_v32 = vadd.f32 %v4218_v22, %v2885_v26  ;;  %v4138_v33 = vpop.f32.mrb[13].mxu1  ;;  %v4220_v34 = vpop.f32.mrb[9].mxu0 }
 0x524   :  { %v5011_v35 = vadd.f32 %v4138_v33, %v2881_v28  ;;  %v5013_v44 = vadd.f32 %v4220_v34, %v2889_v29  ;;  %v4140_v36 = vpop.f32.mrb[14].mxu1  ;;  %v4222_v37 = vpop.f32.mrb[10].mxu0 }
 0x525   :  { %4387 = vst [vmem:[%s6254_s10] sm:$0xff] %v5010_v31  ;;  %4389 = vst [vmem:[%s6254_s10 + $0x10] sm:$0xff] %v5012_v32  ;;  %v4141_v19 = vpop.f32.mrb[15].mxu1  ;;  %v4223_v21 = vpop.f32.mrb[11].mxu0 }
 0x526   :  { %4388 = vst [vmem:[%s6254_s10 + $0x8] sm:$0xff] %v5011_v35  ;;  %4390 = vst [vmem:[%s6254_s10 + $0x18] sm:$0xff] %v5013_v44 }
 0x543   :  { %v4976_v11 = vpop.f32.mrb[12].mxu0 }
 0x544   :  { %v4977_v4 = vpop.f32.mrb[13].mxu0 }
 0x545   :  { %v4978_v38 = vadd.f32 %v4977_v4, %v4976_v11  ;;  %v4979_v39 = vpop.f32.mrb[14].mxu0 }
 0x546   :  { %v4980_v40 = vpop.f32.mrb[15].mxu0 }
 0x547   :  { %v4342_v45 = vadd.f32 %v4978_v38, %v2901_v8 }
 0x563   :  { %v4998_v42 = vpop.f32.mrb[16].mxu0 }
 0x564   :  { %v4999_v43 = vpop.f32.mrb[17].mxu0 }
 0x565   :  { %v5000_v46 = vadd.f32 %v4999_v43, %v4998_v42  ;;  %v5001_v47 = vpop.f32.mrb[18].mxu0 }
 0x566   :  { %v5002_v48 = vpop.f32.mrb[19].mxu0 }
 0x567   :  { %v4382_v49 = vadd.f32 %v5000_v46, %v4342_v45 }
 0x569   :  { %4393 = vst [vmem:[%s6254_s10 + $0x30] sm:$0xff] %v4382_v49 }
 0x5a2   :  { %v4300_v54 = vpop.f32.mrb[16].mxu1 }
 0x5a3   :  { %v5014_v55 = vadd.f32 %v4300_v54, %v2893_v52  ;;  %v4302_v56 = vpop.f32.mrb[17].mxu1 }
 0x5a4   :  { %v5015_v57 = vadd.f32 %v4302_v56, %v2897_v53  ;;  %v4304_v58 = vpop.f32.mrb[18].mxu1 }
 0x5a5   :  { %4391 = vst [vmem:[%s6254_s10 + $0x20] sm:$0xff] %v5014_v55  ;;  %v4305_v24 = vpop.f32.mrb[19].mxu1 }
 0x5a6   :  { %4392 = vst [vmem:[%s6254_s10 + $0x28] sm:$0xff] %v5015_v57 }
 0x5a7   :  { %4406 = vsyncpa [#allocation3], 1 }
 0x5a8   :  { %4407 = vsyncpa [#allocation5], 1 }
 0x5a9   :  { %4408 = vsyncpa [#allocation8], 1 }

</bundles_post_ra>
